<compile_context>
chip_gen: v7x
topology: tpu7x:2x2x1
jax: 0.10.0
libtpu: 0.0.40
codegen_flags: <defaults>
</compile_context>

<pallas_src>
import functools

import jax
import jax.numpy as jnp
from jax.experimental import pallas as pl
from jax.experimental.pallas import tpu as pltpu


HIDDEN = 256
BN_EPS = 1e-5
NEG_INF = -1e30


def _dnn_kernel(x_ref, w1_ref, w2_ref, w3_ref, w4_ref, vec_ref, o_ref):
    hidden = w1_ref.shape[1]
    out_pad = o_ref.shape[1]
    wdt = w1_ref.dtype  # matmul operand dtype (f32 or bf16); accum stays f32

    b1 = vec_ref[0:1, :hidden]
    b2 = vec_ref[1:2, :hidden]
    b3 = vec_ref[2:3, :hidden]
    b4 = vec_ref[3:4, :out_pad]
    msk = vec_ref[4:5, :out_pad]     # 0 on valid lanes, -1e30 on padded lanes

    # fc1 (BN1 already folded into fc2's weights; dropout = identity in eval)
    h = jnp.dot(x_ref[...], w1_ref[...], preferred_element_type=jnp.float32) + b1
    h = jnp.maximum(h, 0.0)

    # fc2 (carries folded BN1)
    h = jnp.dot(h.astype(wdt), w2_ref[...], preferred_element_type=jnp.float32) + b2
    h = jnp.maximum(h, 0.0)

    # fc3 (carries folded BN2)
    h = jnp.dot(h.astype(wdt), w3_ref[...], preferred_element_type=jnp.float32) + b3
    h = jnp.maximum(h, 0.0)

    # fc4 (carries folded BN3), padded to a lane-dense width
    logits = jnp.dot(h.astype(wdt), w4_ref[...], preferred_element_type=jnp.float32) + b4
    logits = jnp.maximum(logits, 0.0) + msk   # mask must come AFTER the ReLU

    # row softmax (stable); reciprocal on the EUP + 1 Newton step for f32 accuracy
    m = jnp.max(logits, axis=1, keepdims=True)
    e = jnp.exp(logits - m)
    denom = jnp.sum(e, axis=1, keepdims=True)
    inv = pl.reciprocal(denom, approx=True)
    inv = inv * (2.0 - denom * inv)
    o_ref[...] = e * inv


@functools.partial(jax.jit, static_argnames=("out_size", "block_b"))
def dnn_forward(x, params, *, out_size, block_b=256):
    """x: (B, input_size) float32.  params: dict from prepare_params()."""
    B, in_size = x.shape
    hidden = params["w1"].shape[1]
    out_pad = params["w4"].shape[1]

    nb = pl.cdiv(B, block_b)
    Bp = nb * block_b
    if Bp != B:
        x = jnp.pad(x, ((0, Bp - B), (0, 0)))
    x = x.astype(params["w1"].dtype)

    full = lambda shape: pl.BlockSpec(shape, lambda i: (0,) * len(shape))

    out = pl.pallas_call(
        _dnn_kernel,
        out_shape=jax.ShapeDtypeStruct((Bp, out_pad), jnp.float32),
        grid_spec=pltpu.PrefetchScalarGridSpec(
            num_scalar_prefetch=0,
            grid=(nb,),
            in_specs=[
                pl.BlockSpec((block_b, in_size), lambda i: (i, 0)),   # x
                full((in_size, hidden)),                              # w1
                full((hidden, hidden)),                               # w2 (BN1 folded)
                full((hidden, hidden)),                               # w3 (BN2 folded)
                full((hidden, out_pad)),                              # w4 (BN3 folded, padded)
                full(params["vec"].shape),                            # biases + lane mask
            ],
            out_specs=pl.BlockSpec((block_b, out_pad), lambda i: (i, 0)),
        ),
        compiler_params=pltpu.CompilerParams(
            dimension_semantics=("parallel",)),
    )(x, params["w1"], params["w2"], params["w3"], params["w4"], params["vec"])

    return out[:B, :out_size]


def init_raw_params(key, input_size, output_size):
    """PyTorch-like raw parameters (linears stored as (in, out)), random BN stats."""
    ks = jax.random.split(key, 20)

    def linear(kw, kb, fan_in, fan_out):
        bound = 1.0 / (fan_in ** 0.5)
        w = jax.random.uniform(kw, (fan_in, fan_out), jnp.float32, -bound, bound)
        b = jax.random.uniform(kb, (fan_out,), jnp.float32, -bound, bound)
        return w, b

    def bn(kg, kb, km, kv, n):
        return dict(
            gamma=jax.random.uniform(kg, (n,), jnp.float32, 0.5, 1.5),
            beta=0.1 * jax.random.normal(kb, (n,), jnp.float32),
            mean=0.1 * jax.random.normal(km, (n,), jnp.float32),
            var=jax.random.uniform(kv, (n,), jnp.float32, 0.5, 1.5),
        )

    w1, b1 = linear(ks[0], ks[1], input_size, HIDDEN)
    w2, b2 = linear(ks[2], ks[3], HIDDEN, HIDDEN)
    w3, b3 = linear(ks[4], ks[5], HIDDEN, HIDDEN)
    w4, b4 = linear(ks[6], ks[7], HIDDEN, output_size)

    return dict(
        w1=w1, b1=b1, w2=w2, b2=b2, w3=w3, b3=b3, w4=w4, b4=b4,
        bn1=bn(ks[8], ks[9], ks[10], ks[11], HIDDEN),
        bn2=bn(ks[12], ks[13], ks[14], ks[15], HIDDEN),
        bn3=bn(ks[16], ks[17], ks[18], ks[19], HIDDEN),
    )


def prepare_params(raw, dtype=jnp.float32):
    """Fold eval-mode BatchNorm into the following linear and pad fc4 lane-dense.

    dtype controls the matmul operand dtype (use jnp.bfloat16 on v6e/v7x for
    ~3x MXU throughput; biases/mask and accumulation stay f32).
    """
    def bn_affine(bn):
        s = bn["gamma"] / jnp.sqrt(bn["var"] + BN_EPS)
        t = bn["beta"] - bn["mean"] * s
        return s, t

    s1, t1 = bn_affine(raw["bn1"])
    s2, t2 = bn_affine(raw["bn2"])
    s3, t3 = bn_affine(raw["bn3"])

    w1, b1 = raw["w1"], raw["b1"]
    w2 = s1[:, None] * raw["w2"]
    b2 = raw["b2"] + t1 @ raw["w2"]
    w3 = s2[:, None] * raw["w3"]
    b3 = raw["b3"] + t2 @ raw["w3"]
    w4 = s3[:, None] * raw["w4"]
    b4 = raw["b4"] + t3 @ raw["w4"]

    hidden = w1.shape[1]
    out_size = w4.shape[1]
    out_pad = ((out_size + 127) // 128) * 128       # lane-dense output width
    vec_w = max(hidden, out_pad)

    w4p = jnp.zeros((hidden, out_pad), jnp.float32).at[:, :out_size].set(w4)

    def padrow(v):
        return jnp.zeros((vec_w,), jnp.float32).at[: v.shape[0]].set(v)

    mask = jnp.where(jnp.arange(vec_w) < out_size, 0.0, NEG_INF).astype(jnp.float32)
    vec = jnp.stack([padrow(b1), padrow(b2), padrow(b3), padrow(b4), mask])

    return dict(
        w1=w1.astype(dtype), w2=w2.astype(dtype), w3=w3.astype(dtype),
        w4=w4p.astype(dtype), vec=vec,
    )


def reference_forward(x, raw):
    """Plain-JAX eval-mode reference with un-folded BatchNorm."""
    def bn_apply(h, bn):
        s = bn["gamma"] / jnp.sqrt(bn["var"] + BN_EPS)
        return (h - bn["mean"]) * s + bn["beta"]

    h = jnp.maximum(x @ raw["w1"] + raw["b1"], 0.0)
    h = bn_apply(h, raw["bn1"])
    h = jnp.maximum(h @ raw["w2"] + raw["b2"], 0.0)
    h = bn_apply(h, raw["bn2"])
    h = jnp.maximum(h @ raw["w3"] + raw["b3"], 0.0)
    h = bn_apply(h, raw["bn3"])
    logits = jnp.maximum(h @ raw["w4"] + raw["b4"], 0.0)
    return jax.nn.softmax(logits, axis=1)


if __name__ == "__main__":
    key = jax.random.PRNGKey(0)
    k_x, k_p = jax.random.split(key)

    # B is deliberately not a multiple of block_b to exercise batch padding;
    # with block_b=256 this yields 2 parallel grid steps (fills both v7x TCs).
    B, INPUT_SIZE, OUTPUT_SIZE = 300, 32, 8
    x = jax.random.normal(k_x, (B, INPUT_SIZE), jnp.float32)

    raw = init_raw_params(k_p, INPUT_SIZE, OUTPUT_SIZE)
    params = prepare_params(raw, dtype=jnp.float32)

    out = dnn_forward(x, params, out_size=OUTPUT_SIZE, block_b=256)
    out = jax.block_until_ready(out)

    ref = reference_forward(x, raw)
    assert out.shape == (B, OUTPUT_SIZE)
    assert jnp.allclose(out, ref, atol=2e-5, rtol=1e-4), "mismatch vs JAX reference"
    assert jnp.allclose(jnp.sum(out, axis=1), 1.0, atol=2e-5), "softmax rows must sum to 1"

    print("KERNEL_OK")
</pallas_src>

<mosaic_0001>
module attributes {stable_mosaic.version = 11 : i64} {
  func.func @_dnn_kernel(%arg0: i32, %arg1: memref<256x32xf32, #tpu.memory_space<vmem>>, %arg2: memref<32x256xf32, #tpu.memory_space<vmem>>, %arg3: memref<256x256xf32, #tpu.memory_space<vmem>>, %arg4: memref<256x256xf32, #tpu.memory_space<vmem>>, %arg5: memref<256x128xf32, #tpu.memory_space<vmem>>, %arg6: memref<5x256xf32, #tpu.memory_space<vmem>>, %arg7: memref<256x128xf32, #tpu.memory_space<vmem>>) attributes {dimension_semantics = [#tpu.dimension_semantics<parallel>], iteration_bounds = array<i64: 2>, scalar_prefetch = 0 : i64, scratch_operands = 0 : i64, tpu.core_type = #tpu.core_type<tc>, window_params = [{transform_indices = @transform_0, window_bounds = array<i64: 256, 32>}, {pipeline_mode = #tpu.pipeline_mode<synchronous>, transform_indices = @transform_1, window_bounds = array<i64: 32, 256>}, {pipeline_mode = #tpu.pipeline_mode<synchronous>, transform_indices = @transform_2, window_bounds = array<i64: 256, 256>}, {pipeline_mode = #tpu.pipeline_mode<synchronous>, transform_indices = @transform_3, window_bounds = array<i64: 256, 256>}, {pipeline_mode = #tpu.pipeline_mode<synchronous>, transform_indices = @transform_4, window_bounds = array<i64: 256, 128>}, {pipeline_mode = #tpu.pipeline_mode<synchronous>, transform_indices = @transform_5, window_bounds = array<i64: 5, 256>}, {transform_indices = @transform_6, window_bounds = array<i64: 256, 128>}]} {
    %c0 = arith.constant 0 : index
    %c0_0 = arith.constant 0 : index
    %0 = vector.load %arg6[%c0, %c0_0] : memref<5x256xf32, #tpu.memory_space<vmem>>, vector<1x256xf32>
    %c1 = arith.constant 1 : index
    %c0_1 = arith.constant 0 : index
    %1 = vector.load %arg6[%c1, %c0_1] : memref<5x256xf32, #tpu.memory_space<vmem>>, vector<1x256xf32>
    %c2 = arith.constant 2 : index
    %c0_2 = arith.constant 0 : index
    %2 = vector.load %arg6[%c2, %c0_2] : memref<5x256xf32, #tpu.memory_space<vmem>>, vector<1x256xf32>
    %c3 = arith.constant 3 : index
    %c0_3 = arith.constant 0 : index
    %3 = vector.load %arg6[%c3, %c0_3] : memref<5x256xf32, #tpu.memory_space<vmem>>, vector<1x128xf32>
    %c4 = arith.constant 4 : index
    %c0_4 = arith.constant 0 : index
    %4 = vector.load %arg6[%c4, %c0_4] : memref<5x256xf32, #tpu.memory_space<vmem>>, vector<1x128xf32>
    %c0_5 = arith.constant 0 : index
    %c0_6 = arith.constant 0 : index
    %5 = vector.load %arg1[%c0_5, %c0_6] : memref<256x32xf32, #tpu.memory_space<vmem>>, vector<256x32xf32>
    %c0_7 = arith.constant 0 : index
    %c0_8 = arith.constant 0 : index
    %6 = vector.load %arg2[%c0_7, %c0_8] : memref<32x256xf32, #tpu.memory_space<vmem>>, vector<32x256xf32>
    %cst = arith.constant dense<0.000000e+00> : vector<256x256xf32>
    %7 = tpu.matmul %5, %6, %cst {dimension_numbers = #tpu.dot_dimension_numbers<[1], [0], [0], [1], [0, 0, 1, 1], [], []>} : vector<256x32xf32>, vector<32x256xf32>, vector<256x256xf32> -> vector<256x256xf32>
    %8 = vector.broadcast %0 : vector<1x256xf32> to vector<256x256xf32>
    %9 = arith.addf %7, %8 : vector<256x256xf32>
    %cst_9 = arith.constant 0.000000e+00 : f32
    %10 = vector.broadcast %cst_9 : f32 to vector<256x256xf32>
    %11 = arith.maximumf %9, %10 : vector<256x256xf32>
    %c0_10 = arith.constant 0 : index
    %c0_11 = arith.constant 0 : index
    %12 = vector.load %arg3[%c0_10, %c0_11] : memref<256x256xf32, #tpu.memory_space<vmem>>, vector<256x256xf32>
    %cst_12 = arith.constant dense<0.000000e+00> : vector<256x256xf32>
    %13 = tpu.matmul %11, %12, %cst_12 {dimension_numbers = #tpu.dot_dimension_numbers<[1], [0], [0], [1], [0, 0, 1, 1], [], []>} : vector<256x256xf32>, vector<256x256xf32>, vector<256x256xf32> -> vector<256x256xf32>
    %14 = vector.broadcast %1 : vector<1x256xf32> to vector<256x256xf32>
    %15 = arith.addf %13, %14 : vector<256x256xf32>
    %cst_13 = arith.constant 0.000000e+00 : f32
    %16 = vector.broadcast %cst_13 : f32 to vector<256x256xf32>
    %17 = arith.maximumf %15, %16 : vector<256x256xf32>
    %c0_14 = arith.constant 0 : index
    %c0_15 = arith.constant 0 : index
    %18 = vector.load %arg4[%c0_14, %c0_15] : memref<256x256xf32, #tpu.memory_space<vmem>>, vector<256x256xf32>
    %cst_16 = arith.constant dense<0.000000e+00> : vector<256x256xf32>
    %19 = tpu.matmul %17, %18, %cst_16 {dimension_numbers = #tpu.dot_dimension_numbers<[1], [0], [0], [1], [0, 0, 1, 1], [], []>} : vector<256x256xf32>, vector<256x256xf32>, vector<256x256xf32> -> vector<256x256xf32>
    %20 = vector.broadcast %2 : vector<1x256xf32> to vector<256x256xf32>
    %21 = arith.addf %19, %20 : vector<256x256xf32>
    %cst_17 = arith.constant 0.000000e+00 : f32
    %22 = vector.broadcast %cst_17 : f32 to vector<256x256xf32>
    %23 = arith.maximumf %21, %22 : vector<256x256xf32>
    %c0_18 = arith.constant 0 : index
    %c0_19 = arith.constant 0 : index
    %24 = vector.load %arg5[%c0_18, %c0_19] : memref<256x128xf32, #tpu.memory_space<vmem>>, vector<256x128xf32>
    %cst_20 = arith.constant dense<0.000000e+00> : vector<256x128xf32>
    %25 = tpu.matmul %23, %24, %cst_20 {dimension_numbers = #tpu.dot_dimension_numbers<[1], [0], [0], [1], [0, 0, 1, 1], [], []>} : vector<256x256xf32>, vector<256x128xf32>, vector<256x128xf32> -> vector<256x128xf32>
    %26 = vector.broadcast %3 : vector<1x128xf32> to vector<256x128xf32>
    %27 = arith.addf %25, %26 : vector<256x128xf32>
    %cst_21 = arith.constant 0.000000e+00 : f32
    %28 = vector.broadcast %cst_21 : f32 to vector<256x128xf32>
    %29 = arith.maximumf %27, %28 : vector<256x128xf32>
    %30 = vector.broadcast %4 : vector<1x128xf32> to vector<256x128xf32>
    %31 = arith.addf %29, %30 : vector<256x128xf32>
    %cst_22 = arith.constant dense<0xFF800000> : vector<256xf32>
    %32 = vector.multi_reduction <maximumf>, %31, %cst_22 [1] : vector<256x128xf32> to vector<256xf32>
    %33 = vector.shape_cast %32 : vector<256xf32> to vector<256x1xf32>
    %34 = vector.broadcast %33 : vector<256x1xf32> to vector<256x128xf32>
    %35 = arith.subf %31, %34 : vector<256x128xf32>
    %36 = math.exp %35 : vector<256x128xf32>
    %cst_23 = arith.constant dense<0.000000e+00> : vector<256xf32>
    %37 = vector.multi_reduction <add>, %36, %cst_23 [1] : vector<256x128xf32> to vector<256xf32>
    %38 = vector.shape_cast %37 : vector<256xf32> to vector<256x1xf32>
    %39 = tpu.reciprocal %38 {approx = true} : vector<256x1xf32> -> vector<256x1xf32>
    %40 = arith.mulf %38, %39 : vector<256x1xf32>
    %cst_24 = arith.constant 2.000000e+00 : f32
    %41 = vector.broadcast %cst_24 : f32 to vector<256x1xf32>
    %42 = arith.subf %41, %40 : vector<256x1xf32>
    %43 = arith.mulf %39, %42 : vector<256x1xf32>
    %44 = vector.broadcast %43 : vector<256x1xf32> to vector<256x128xf32>
    %45 = arith.mulf %36, %44 : vector<256x128xf32>
    %c0_25 = arith.constant 0 : index
    %c0_26 = arith.constant 0 : index
    %46 = vector.load %arg7[%c0_25, %c0_26] : memref<256x128xf32, #tpu.memory_space<vmem>>, vector<256x128xf32>
    tpu.vector_store %arg7[%c0_25, %c0_26], %45 {strides = array<i32>} : memref<256x128xf32, #tpu.memory_space<vmem>>, vector<256x128xf32>,
    return
  }
  func.func @transform_0(%arg0: i32) -> (i32, i32) {
    %c0_i32 = arith.constant 0 : i32
    %c0_i32_0 = arith.constant 0 : i32
    return %arg0, %c0_i32 : i32, i32
  }
  func.func @transform_1(%arg0: i32) -> (i32, i32) {
    %c0_i32 = arith.constant 0 : i32
    %c0_i32_0 = arith.constant 0 : i32
    %c0_i32_1 = arith.constant 0 : i32
    return %c0_i32, %c0_i32_0 : i32, i32
  }
  func.func @transform_2(%arg0: i32) -> (i32, i32) {
    %c0_i32 = arith.constant 0 : i32
    %c0_i32_0 = arith.constant 0 : i32
    %c0_i32_1 = arith.constant 0 : i32
    return %c0_i32, %c0_i32_0 : i32, i32
  }
  func.func @transform_3(%arg0: i32) -> (i32, i32) {
    %c0_i32 = arith.constant 0 : i32
    %c0_i32_0 = arith.constant 0 : i32
    %c0_i32_1 = arith.constant 0 : i32
    return %c0_i32, %c0_i32_0 : i32, i32
  }
  func.func @transform_4(%arg0: i32) -> (i32, i32) {
    %c0_i32 = arith.constant 0 : i32
    %c0_i32_0 = arith.constant 0 : i32
    %c0_i32_1 = arith.constant 0 : i32
    return %c0_i32, %c0_i32_0 : i32, i32
  }
  func.func @transform_5(%arg0: i32) -> (i32, i32) {
    %c0_i32 = arith.constant 0 : i32
    %c0_i32_0 = arith.constant 0 : i32
    %c0_i32_1 = arith.constant 0 : i32
    return %c0_i32, %c0_i32_0 : i32, i32
  }
  func.func @transform_6(%arg0: i32) -> (i32, i32) {
    %c0_i32 = arith.constant 0 : i32
    %c0_i32_0 = arith.constant 0 : i32
    return %arg0, %c0_i32 : i32, i32
  }
}

</mosaic_0001>

<bundles_post_ra>
// kernel: dnn_forward.1
= control target key start
LH: loop header
LB: loop body
LE: loop exit
PB: predicated region body
PF: predicated region fallthrough
CT: control target
= control target key end

     0   :  { %11 = vsyncpa [#allocation3], 0  ;;  %s2837_s21 = smov 0   ;;  %s4028_s0 = inlined_call_operand.vmem [shape: f32[512,32], index: 0, kind: input, shape index: {}]   ;;  %s4029_s1 = inlined_call_operand.vmem [shape: f32[32,256], index: 1, kind: input, shape index: {}]   ;;  %s4030_s2 = inlined_call_operand.vmem [shape: f32[256,256], index: 2, kind: input, shape index: {}]   ;;  %s4031_s3 = inlined_call_operand.vmem [shape: f32[256,256], index: 3, kind: input, shape index: {}]   ;;  %s4032_s4 = inlined_call_operand.hbm [shape: f32[256,128], index: 4, kind: input, shape index: {}]   ;;  %s4033_s5 = inlined_call_operand.vmem [shape: f32[5,256], index: 5, kind: input, shape index: {}]   ;;  %s4034_s6 = inlined_call_operand.vmem [shape: f32[512,128], index: 6, kind: output, shape index: {}]  }
   0x1 LB: > { %s2343_s22 = sadd.s32 4294967295, %s2795_s21   ;;  %p2345_p0 = scmp.ge.s32.totalorder %s2795_s21, 1  ;;  %s2795_s21 = sphi %s2837_s21, %s17_s21  }
   0x2   : > { %p179_p1 = scmp.lt.s32.totalorder %s2795_s21, 3  ;;  %s2797_s23 = smov [#allocation2]  }
   0x3   : > { %s200_s24 = sshll.u32 %s2797_s23, 4  ;;  %p2851_p3 = scmp.eq.s32.totalorder %s2343_s22, 0  ;;  %s201_s24 = int_to_ptr.vmem [resolvable:$true] %s200_s24 }
   0x4   : > { %p2845_p2 = pnand %p2345_p0, %p179_p1  ;;  %s2757_s30 = scalar_lea.hbm %s4032_s4, 4096 }
   0x5   : > { %s4039_s26 = scalar_select %p2851_p3, 1, 0 }
   0x6   : > { %s4038_s25 = scalar_select %p2845_p2, 1, 0 }
   0x7   : > { %p2610_p4 = pneg %p2845_p2  ;;  %p2758_p6 = scmp.ne.s32.totalorder %s4032_s4, %s2757_s30 }
   0x8   : > { %p2764_p10 = scmp.lt.u32.totalorder %s2757_s30, %s4032_s4 }
   0x9   : > { %p2859_p5 = pnand %p2851_p3, %p2610_p4 }
   0xb   : > { %p2759_p7 = pneg %p2859_p5 }
   0xd   : > { %p2760_p8 = pnand %p2759_p7, %p2758_p6 }
   0xf   : > { %p2761_p9 = pneg %p2760_p8 }
  0x11   : > { %p2766_p11 = pnand %p2764_p10, %p2761_p9 }
  0x13   : > { %2769 = shalt.err (!%p2766_p11)
}
  0x14   : > { %s2770_s11 = scalar_lea.vmem %s201_s24, 4096  ;;  %p2778_p1 = scmp.lt.s32.totalorder %s201_s24, %s201_s24 }
  0x15   : > { %p2771_p12 = scmp.ne.s32.totalorder %s201_s24, %s2770_s11  ;;  %p2779_p4 = scmp.lt.s32.totalorder %s2770_s11, %s2770_s11 }
  0x17   : > { %p2773_p13 = pnand %p2771_p12, %p2759_p7  ;;  %p2780_p3 = por %p2779_p4, %p2778_p1 }
  0x19   : > { %p2774_p0 = pneg %p2773_p13 }
  0x1b   : > { %p2781_p2 = pnand %p2780_p3, %p2774_p0 }
  0x1d   : > { %2784 = shalt.err (!%p2781_p2)
}
  0x1e   : > { %s2798_s12 = smov 128   ;;  %s2799_s13 = smov 8  }
  0x1f   : > { %2613 = dma.hbm_to_vmem [thread:$0]  (!%p2859_p5), %s4032_s4, 4096, %s201_s24, [#allocation3], %s2798_s12, %s2798_s12, %s2799_s13  }
  0x20   : > { %p4041_p6 = scmp.ne.s32.totalorder %s4038_s25, 0 }
  0x21   : > { %p4042_p8 = scmp.ne.s32.totalorder (!%p4041_p6), %s4039_s26, 0 }
  0x22   : > { %228 = sbr.rel (%p4041_p6) target bundleno = 1368 (0x558), region = 44 }
  0x29   : > { %2790 = dma.done.wait (%p4042_p8), [#allocation3], 4096  }
  0x2a   : > { %2792 = vsyncadd (%p4042_p8), [#allocation3], 4294963200  ;;  %s2350_s16 = sshll.u32 %s2343_s22, 5  ;;  %v2800_v0 = vmov 0.0   ;;  %v310_v1 = vld [vmem:[%s4029_s1 + $0x8] sm:$0xff]  ;;  %v312_v2 = vld [vmem:[%s4029_s1 + $0x18] sm:$0xff] }
  0x2b   : > { %489 = vmatprep.mubr.f32.mxu0 %v2800_v0  ;;  %p259_p2 = scmp.lt.s32.totalorder %s2350_s16, 63  ;;  %v309_v3 = vld [vmem:[%s4029_s1] sm:$0xff]  ;;  %v2390_v4 = vpack.c.bf16 %v312_v2, %v310_v1  ;;  %v311_v5 = vld [vmem:[%s4029_s1 + $0x10] sm:$0xff]  ;;  %v314_v6 = vld [vmem:[%s4029_s1 + $0x28] sm:$0xff]  ;;  %vm328_vm0 = vcmask 261120  }
  0x2c   : > { %v316_v7 = vld [vmem:[%s4029_s1 + $0x38] sm:$0xff]  ;;  %v2392_v8 = vpack.c.bf16 %v311_v5, %v309_v3  ;;  %v313_v10 = vld [vmem:[%s4029_s1 + $0x20] sm:$0xff]  ;;  %v315_v11 = vld [vmem:[%s4029_s1 + $0x30] sm:$0xff] }
  0x2d   : > { %s4044_s16 = smov (!%p259_p2, %s2350_s16), 63  ;;  %v2394_v9 = vpack.c.bf16 %v316_v7, %v314_v6  ;;  %2391 = vmatprep.subr.bf16.mxu0 %v2390_v4  ;;  %v2396_v12 = vpack.c.bf16 %v315_v11, %v313_v10  ;;  %v747_v15 = vld [vmem:[%s4030_s2 + $0x8] sm:$0xff]  ;;  %v749_v16 = vld [vmem:[%s4030_s2 + $0x18] sm:$0xff]  ;;  %v746_v18 = vld [vmem:[%s4030_s2] sm:$0xff] }
  0x2e   : > { %s2351_s10 = sshll.u32 %s4044_s16, 3  ;;  %2393 = vmatpush1.bf16.msra.mxu0 %v2392_v8  ;;  %v2398_v17 = vpack.c.bf16 %v749_v16, %v747_v15  ;;  %v748_v19 = vld [vmem:[%s4030_s2 + $0x10] sm:$0xff]  ;;  %v751_v20 = vld [vmem:[%s4030_s2 + $0x28] sm:$0xff]  ;;  %v753_v22 = vld [vmem:[%s4030_s2 + $0x38] sm:$0xff] }
  0x2f   : > { %2395 = vmatprep.subr.bf16.mxu0 %v2394_v9  ;;  %s2920_s13 = scalar_lea.vmem %s4028_s0, %s2351_s10  ;;  %v2400_v21 = vpack.c.bf16 %v748_v19, %v746_v18  ;;  %v750_v23 = vld [vmem:[%s4030_s2 + $0x20] sm:$0xff]  ;;  %v752_v24 = vld [vmem:[%s4030_s2 + $0x30] sm:$0xff]  ;;  %v2402_v26 = vpack.c.bf16 %v753_v22, %v751_v20  ;;  %v755_v27 = vld [vmem:[%s4030_s2 + $0x48] sm:$0xff]  ;;  %s3959_s15 = scalar_lea.vmem %s4034_s6, %s2351_s10 }
  0x30   : > { %v277_v13 = vld [vmem:[%s2920_s13] sm:$0xff]  ;;  %v278_v14 = vld [vmem:[%s2920_s13 + $0x8] sm:$0xff]  ;;  %v279_v25 = vld [vmem:[%s2920_s13 + $0x10] sm:$0xff]  ;;  %2399 = vmatprep.subr.bf16.mxu1 %v2398_v17  ;;  %v2404_v29 = vpack.c.bf16 %v752_v24, %v750_v23 }
  0x31   : > { %v757_v28 = vld [vmem:[%s4030_s2 + $0x58] sm:$0xff]  ;;  %2401 = vmatpush1.bf16.msra.mxu1 %v2400_v21  ;;  %v754_v31 = vld [vmem:[%s4030_s2 + $0x40] sm:$0xff]  ;;  %v756_v32 = vld [vmem:[%s4030_s2 + $0x50] sm:$0xff] }
  0x32   : > { %2397 = vmatpush1.bf16.msra.mxu0 %v2396_v12  ;;  %2403 = vmatprep.subr.bf16.mxu1 %v2402_v26  ;;  %v2406_v30 = vpack.c.bf16 %v757_v28, %v755_v27  ;;  %v759_v33 = vld [vmem:[%s4030_s2 + $0x68] sm:$0xff]  ;;  %v761_v34 = vld [vmem:[%s4030_s2 + $0x78] sm:$0xff]  ;;  %v2408_v36 = vpack.c.bf16 %v756_v32, %v754_v31  ;;  %v758_v38 = vld [vmem:[%s4030_s2 + $0x60] sm:$0xff] }
  0x33   : > { %v280_v35 = vld [vmem:[%s2920_s13 + $0x18] sm:$0xff]  ;;  %v2410_v37 = vpack.c.bf16 %v761_v34, %v759_v33  ;;  %v760_v39 = vld [vmem:[%s4030_s2 + $0x70] sm:$0xff]  ;;  %v763_v40 = vld [vmem:[%s4030_s2 + $0x88] sm:$0xff] }
  0x34   : > { %v765_v41 = vld [vmem:[%s4030_s2 + $0x98] sm:$0xff]  ;;  %v281_v42 = vld [vmem:[%s2920_s13 + $0x20] sm:$0xff]  ;;  %v2412_v43 = vpack.c.bf16 %v760_v39, %v758_v38  ;;  %v764_v46 = vld [vmem:[%s4030_s2 + $0x90] sm:$0xff] }
  0x35   : > { %2356 = vmatmul.mubr.msk.f32.vlgmr.msra.gmra.mrb[0].mxu0 %vm328_vm0, %v277_v13  ;;  %2405 = vmatpush1.bf16.msra.mxu1 %v2404_v29  ;;  %v2414_v44 = vpack.c.bf16 %v765_v41, %v763_v40  ;;  %v762_v45 = vld [vmem:[%s4030_s2 + $0x80] sm:$0xff]  ;;  %v767_v47 = vld [vmem:[%s4030_s2 + $0xa8] sm:$0xff]  ;;  %v769_v48 = vld [vmem:[%s4030_s2 + $0xb8] sm:$0xff] }
  0x36   : > { %495 = vmatprep.mubr.f32.mxu0 %v2800_v0  ;;  %2407 = vmatprep.subr.bf16.mxu1 %v2406_v30  ;;  %v282_v49 = vld [vmem:[%s2920_s13 + $0x28] sm:$0xff]  ;;  %v2416_v50 = vpack.c.bf16 %v764_v46, %v762_v45  ;;  %v2418_v51 = vpack.c.bf16 %v769_v48, %v767_v47  ;;  %v766_v52 = vld [vmem:[%s4030_s2 + $0xa0] sm:$0xff]  ;;  %v768_v53 = vld [vmem:[%s4030_s2 + $0xb0] sm:$0xff] }
  0x37   : > { %v771_v54 = vld [vmem:[%s4030_s2 + $0xc8] sm:$0xff]  ;;  %v773_v55 = vld [vmem:[%s4030_s2 + $0xd8] sm:$0xff]  ;;  %v283_v56 = vld [vmem:[%s2920_s13 + $0x30] sm:$0xff]  ;;  %v2420_v57 = vpack.c.bf16 %v768_v53, %v766_v52 }
  0x38   : > { %v2422_v58 = vpack.c.bf16 %v773_v55, %v771_v54  ;;  %v770_v59 = vld [vmem:[%s4030_s2 + $0xc0] sm:$0xff]  ;;  %v772_v60 = vld [vmem:[%s4030_s2 + $0xd0] sm:$0xff]  ;;  %v775_v61 = vld [vmem:[%s4030_s2 + $0xe8] sm:$0xff] }
  0x39   : > { %2357 = vmatmul.mubr.msk.f32.gmra.mrb[2].mxu0 %vm328_vm0, %v278_v14  ;;  %2409 = vmatpush1.bf16.msra.mxu1 %v2408_v36  ;;  %v777_v62 = vld [vmem:[%s4030_s2 + $0xf8] sm:$0xff]  ;;  %v2424_v1 = vpack.c.bf16 %v772_v60, %v770_v59  ;;  %v774_v3 = vld [vmem:[%s4030_s2 + $0xe0] sm:$0xff]  ;;  %v776_v4 = vld [vmem:[%s4030_s2 + $0xf0] sm:$0xff] }
  0x3a   : > { %501 = vmatprep.mubr.f32.mxu0 %v2800_v0  ;;  %2411 = vmatprep.subr.bf16.mxu1 %v2410_v37  ;;  %v284_v63 = vld [vmem:[%s2920_s13 + $0x38] sm:$0xff]  ;;  %v2426_v2 = vpack.c.bf16 %v777_v62, %v775_v61  ;;  %v779_v5 = vld [vmem:[%s4030_s2 + $0x108] sm:$0xff]  ;;  %v285_v7 = vld [vmem:[%s2920_s13 + $0x40] sm:$0xff]  ;;  %v2428_v8 = vpack.c.bf16 %v776_v4, %v774_v3 }
  0x3b   : > { %v781_v6 = vld [vmem:[%s4030_s2 + $0x118] sm:$0xff]  ;;  %v778_v10 = vld [vmem:[%s4030_s2 + $0x100] sm:$0xff]  ;;  %v780_v11 = vld [vmem:[%s4030_s2 + $0x110] sm:$0xff] }
  0x3c   : > { %v2430_v9 = vpack.c.bf16 %v781_v6, %v779_v5  ;;  %v783_v12 = vld [vmem:[%s4030_s2 + $0x128] sm:$0xff]  ;;  %v785_v13 = vld [vmem:[%s4030_s2 + $0x138] sm:$0xff]  ;;  %v2432_v15 = vpack.c.bf16 %v780_v11, %v778_v10  ;;  %v782_v17 = vld [vmem:[%s4030_s2 + $0x120] sm:$0xff] }
  0x3d   : > { %2358 = vmatmul.mubr.msk.f32.gmra.mrb[4].mxu0 %vm328_vm0, %v279_v25  ;;  %2413 = vmatpush1.bf16.msra.mxu1 %v2412_v43  ;;  %v286_v14 = vld [vmem:[%s2920_s13 + $0x48] sm:$0xff]  ;;  %v2434_v16 = vpack.c.bf16 %v785_v13, %v783_v12  ;;  %v784_v18 = vld [vmem:[%s4030_s2 + $0x130] sm:$0xff]  ;;  %v789_v20 = vld [vmem:[%s4030_s2 + $0x158] sm:$0xff] }
  0x3e   : > { %507 = vmatprep.mubr.f32.mxu0 %v2800_v0  ;;  %2415 = vmatprep.subr.bf16.mxu1 %v2414_v44  ;;  %v787_v19 = vld [vmem:[%s4030_s2 + $0x148] sm:$0xff]  ;;  %v287_v21 = vld [vmem:[%s2920_s13 + $0x50] sm:$0xff]  ;;  %v2436_v22 = vpack.c.bf16 %v784_v18, %v782_v17  ;;  %v786_v24 = vld [vmem:[%s4030_s2 + $0x140] sm:$0xff] }
  0x3f   : > { %v2438_v23 = vpack.c.bf16 %v789_v20, %v787_v19  ;;  %v788_v25 = vld [vmem:[%s4030_s2 + $0x150] sm:$0xff]  ;;  %v791_v26 = vld [vmem:[%s4030_s2 + $0x168] sm:$0xff]  ;;  %v793_v27 = vld [vmem:[%s4030_s2 + $0x178] sm:$0xff] }
  0x40   : > { %v288_v28 = vld [vmem:[%s2920_s13 + $0x58] sm:$0xff]  ;;  %v2440_v29 = vpack.c.bf16 %v788_v25, %v786_v24  ;;  %v2442_v30 = vpack.c.bf16 %v793_v27, %v791_v26  ;;  %v790_v31 = vld [vmem:[%s4030_s2 + $0x160] sm:$0xff]  ;;  %v792_v32 = vld [vmem:[%s4030_s2 + $0x170] sm:$0xff]  ;;  %v318_v26 = vlaneseq }
  0x41   : > { %2359 = vmatmul.mubr.msk.f32.gmra.mrb[6].mxu0 %vm328_vm0, %v280_v35  ;;  %2417 = vmatpush1.bf16.msra.mxu1 %v2416_v50  ;;  %v795_v33 = vld [vmem:[%s4030_s2 + $0x188] sm:$0xff]  ;;  %v797_v34 = vld [vmem:[%s4030_s2 + $0x198] sm:$0xff]  ;;  %v289_v35 = vld [vmem:[%s2920_s13 + $0x60] sm:$0xff]  ;;  %v2444_v36 = vpack.c.bf16 %v792_v32, %v790_v31 }
  0x42   : > { %513 = vmatprep.mubr.f32.mxu0 %v2800_v0  ;;  %2419 = vmatprep.subr.bf16.mxu1 %v2418_v51  ;;  %v2446_v37 = vpack.c.bf16 %v797_v34, %v795_v33  ;;  %v794_v38 = vld [vmem:[%s4030_s2 + $0x180] sm:$0xff]  ;;  %v796_v39 = vld [vmem:[%s4030_s2 + $0x190] sm:$0xff]  ;;  %v799_v40 = vld [vmem:[%s4030_s2 + $0x1a8] sm:$0xff]  ;;  %v319_v32 = vshrl.u32 %v318_v26, 7 }
  0x43   : > { %v801_v41 = vld [vmem:[%s4030_s2 + $0x1b8] sm:$0xff]  ;;  %v2448_v43 = vpack.c.bf16 %v796_v39, %v794_v38  ;;  %v798_v45 = vld [vmem:[%s4030_s2 + $0x1a0] sm:$0xff]  ;;  %v800_v46 = vld [vmem:[%s4030_s2 + $0x1b0] sm:$0xff] }
  0x44   : > { %v2450_v44 = vpack.c.bf16 %v801_v41, %v799_v40  ;;  %v803_v47 = vld [vmem:[%s4030_s2 + $0x1c8] sm:$0xff]  ;;  %v805_v48 = vld [vmem:[%s4030_s2 + $0x1d8] sm:$0xff]  ;;  %v2452_v50 = vpack.c.bf16 %v800_v46, %v798_v45  ;;  %v293_v53 = vld [vmem:[%s2920_s13 + $0x80] sm:$0xff]  ;;  %v3245_v34 = vsub.s32 0, %v319_v32 }
  0x45   : > { %2360 = vmatmul.mubr.msk.f32.gmra.mrb[8].mxu0 %vm328_vm0, %v281_v42  ;;  %2421 = vmatpush1.bf16.msra.mxu1 %v2420_v57  ;;  %v290_v42 = vld [vmem:[%s2920_s13 + $0x68] sm:$0xff]  ;;  %v2454_v51 = vpack.c.bf16 %v805_v48, %v803_v47  ;;  %v292_v52 = vld [vmem:[%s2920_s13 + $0x78] sm:$0xff]  ;;  %v295_v55 = vld [vmem:[%s2920_s13 + $0x90] sm:$0xff] }
  0x46   : > { %519 = vmatprep.mubr.f32.mxu0 %v2800_v0  ;;  %2423 = vmatprep.subr.bf16.mxu1 %v2422_v58  ;;  %v294_v54 = vld [vmem:[%s2920_s13 + $0x88] sm:$0xff]  ;;  %v297_v57 = vld [vmem:[%s2920_s13 + $0xa0] sm:$0xff]  ;;  %v804_v59 = vld [vmem:[%s4030_s2 + $0x1d0] sm:$0xff] }
  0x47   : > { %v802_v58 = vld [vmem:[%s4030_s2 + $0x1c0] sm:$0xff]  ;;  %v298_v60 = vld [vmem:[%s2920_s13 + $0xa8] sm:$0xff]  ;;  %v808_v3 = vld [vmem:[%s4030_s2 + $0x1f0] sm:$0xff] }
  0x48   : > { %v2456_v61 = vpack.c.bf16 %v804_v59, %v802_v58  ;;  %v807_v62 = vld [vmem:[%s4030_s2 + $0x1e8] sm:$0xff]  ;;  %v299_v4 = vld [vmem:[%s2920_s13 + $0xb0] sm:$0xff]  ;;  %v300_v6 = vld [vmem:[%s2920_s13 + $0xb8] sm:$0xff] }
  0x49   : > { %2361 = vmatmul.mubr.msk.f32.gmra.mrb[10].mxu0 %vm328_vm0, %v282_v49  ;;  %2425 = vmatpush1.bf16.msra.mxu1 %v2424_v1  ;;  %v291_v49 = vld [vmem:[%s2920_s13 + $0x70] sm:$0xff]  ;;  %v304_v10 = vld [vmem:[%s2920_s13 + $0xd8] sm:$0xff]  ;;  %v305_v11 = vld [vmem:[%s2920_s13 + $0xe0] sm:$0xff] }
  0x4a   : > { %525 = vmatprep.mubr.f32.mxu0 %v2800_v0  ;;  %2427 = vmatprep.subr.bf16.mxu1 %v2426_v2  ;;  %v806_v2 = vld [vmem:[%s4030_s2 + $0x1e0] sm:$0xff]  ;;  %v306_v12 = vld [vmem:[%s2920_s13 + $0xe8] sm:$0xff]  ;;  %v307_v13 = vld [vmem:[%s2920_s13 + $0xf0] sm:$0xff] }
  0x4b   : > { %v2460_v5 = vpack.c.bf16 %v808_v3, %v806_v2  ;;  %v1142_v18 = vld [vmem:[%s4031_s3] sm:$0xff]  ;;  %v1147_v20 = vld [vmem:[%s4031_s3 + $0x28] sm:$0xff]  ;;  %v1148_v24 = vld [vmem:[%s4031_s3 + $0x30] sm:$0xff] }
  0x4c   : > { %v1151_v27 = vld [vmem:[%s4031_s3 + $0x48] sm:$0xff]  ;;  %v1152_v31 = vld [vmem:[%s4031_s3 + $0x50] sm:$0xff]  ;;  %v1157_v38 = vld [vmem:[%s4031_s3 + $0x78] sm:$0xff] }
  0x4d   : > { %2362 = vmatmul.mubr.msk.f32.gmra.mrb[12].mxu0 %vm328_vm0, %v283_v56  ;;  %2429 = vmatpush1.bf16.msra.mxu1 %v2428_v8  ;;  %v296_v56 = vld [vmem:[%s2920_s13 + $0x98] sm:$0xff]  ;;  %v302_v8 = vld [vmem:[%s2920_s13 + $0xc8] sm:$0xff]  ;;  %v1154_v40 = vld [vmem:[%s4031_s3 + $0x60] sm:$0xff] }
  0x4e   : > { %531 = vmatprep.mubr.f32.mxu0 %v2800_v0  ;;  %2431 = vmatprep.subr.bf16.mxu1 %v2430_v9  ;;  %v303_v9 = vld [vmem:[%s2920_s13 + $0xd0] sm:$0xff]  ;;  %v1159_v46 = vld [vmem:[%s4031_s3 + $0x88] sm:$0xff]  ;;  %v1161_v47 = vld [vmem:[%s4031_s3 + $0x98] sm:$0xff] }
  0x4f   : > { %v1156_v41 = vld [vmem:[%s4031_s3 + $0x70] sm:$0xff]  ;;  %v1158_v48 = vld [vmem:[%s4031_s3 + $0x80] sm:$0xff] }
  0x51   : > { %2363 = vmatmul.mubr.msk.f32.gmra.mrb[14].mxu0 %vm328_vm0, %v284_v63  ;;  %2433 = vmatpush1.bf16.msra.mxu1 %v2432_v15  ;;  %v809_v63 = vld [vmem:[%s4030_s2 + $0x1f8] sm:$0xff]  ;;  %v1143_v15 = vld [vmem:[%s4031_s3 + $0x8] sm:$0xff] }
  0x52   : > { %537 = vmatprep.mubr.f32.mxu0 %v2800_v0  ;;  %2435 = vmatprep.subr.bf16.mxu1 %v2434_v16  ;;  %v2458_v1 = vpack.c.bf16 %v809_v63, %v807_v62  ;;  %v1145_v16 = vld [vmem:[%s4031_s3 + $0x18] sm:$0xff]  ;;  %v1167_v62 = vld [vmem:[%s4031_s3 + $0xc8] sm:$0xff] }
  0x53   : > { %v2462_v17 = vpack.c.bf16 %v1145_v16, %v1143_v15  ;;  %v1169_v63 = vld [vmem:[%s4031_s3 + $0xd8] sm:$0xff] }
  0x55   : > { %2364 = vmatmul.mubr.msk.f32.gmra.mrb[16].mxu0 %vm328_vm0, %v285_v7  ;;  %2437 = vmatpush1.bf16.msra.mxu1 %v2436_v22  ;;  %v301_v7 = vld [vmem:[%s2920_s13 + $0xc0] sm:$0xff] }
  0x56   : > { %543 = vmatprep.mubr.f32.mxu0 %v2800_v0  ;;  %2439 = vmatprep.subr.bf16.mxu1 %v2438_v23  ;;  %v1146_v23 = vld [vmem:[%s4031_s3 + $0x20] sm:$0xff] }
  0x57   : > { %2463 = vmatprep.subr.bf16.mxu0 %v2462_v17  ;;  %v2468_v25 = vpack.c.bf16 %v1148_v24, %v1146_v23 }
  0x59   : > { %2365 = vmatmul.mubr.msk.f32.gmra.mrb[18].mxu0 %vm328_vm0, %v286_v14  ;;  %2441 = vmatpush1.bf16.msra.mxu1 %v2440_v29  ;;  %v308_v14 = vld [vmem:[%s2920_s13 + $0xf8] sm:$0xff] }
  0x5a   : > { %549 = vmatprep.mubr.f32.mxu0 %v2800_v0  ;;  %2443 = vmatprep.subr.bf16.mxu1 %v2442_v30  ;;  %v1150_v30 = vld [vmem:[%s4031_s3 + $0x40] sm:$0xff] }
  0x5b   : > { %v2472_v33 = vpack.c.bf16 %v1152_v31, %v1150_v30  ;;  %v1176_v30 = vld [vmem:[%s4031_s3 + $0x110] sm:$0xff] }
  0x5d   : > { %2366 = vmatmul.mubr.msk.f32.gmra.mrb[20].mxu0 %vm328_vm0, %v287_v21  ;;  %2445 = vmatpush1.bf16.msra.mxu1 %v2444_v36  ;;  %v1149_v21 = vld [vmem:[%s4031_s3 + $0x38] sm:$0xff]  ;;  %v3250_v36 = vsub.s32 1, %v319_v32  ;;  %v1179_v32 = vld [vmem:[%s4031_s3 + $0x128] sm:$0xff] }
  0x5e   : > { %555 = vmatprep.mubr.f32.mxu0 %v2800_v0  ;;  %2447 = vmatprep.subr.bf16.mxu1 %v2446_v37  ;;  %v2466_v22 = vpack.c.bf16 %v1149_v21, %v1147_v20  ;;  %v1155_v37 = vld [vmem:[%s4031_s3 + $0x68] sm:$0xff]  ;;  %v1177_v21 = vld [vmem:[%s4031_s3 + $0x118] sm:$0xff] }
  0x5f   : > { %v2474_v39 = vpack.c.bf16 %v1157_v38, %v1155_v37  ;;  %v1175_v20 = vld [vmem:[%s4031_s3 + $0x108] sm:$0xff] }
  0x61   : > { %2367 = vmatmul.mubr.msk.f32.gmra.mrb[22].mxu0 %vm328_vm0, %v288_v28  ;;  %2449 = vmatpush1.bf16.msra.mxu1 %v2448_v43  ;;  %v1153_v28 = vld [vmem:[%s4031_s3 + $0x58] sm:$0xff]  ;;  %v2476_v43 = vpack.c.bf16 %v1156_v41, %v1154_v40 }
  0x62   : > { %561 = vmatprep.mubr.f32.mxu0 %v2800_v0  ;;  %2451 = vmatprep.subr.bf16.mxu1 %v2450_v44  ;;  %v2470_v29 = vpack.c.bf16 %v1153_v28, %v1151_v27  ;;  %v2494_v28 = vpack.c.bf16 %v1177_v21, %v1175_v20  ;;  %v1195_v20 = vld [vmem:[%s4031_s3 + $0x1a8] sm:$0xff]  ;;  %v1197_v21 = vld [vmem:[%s4031_s3 + $0x1b8] sm:$0xff] }
  0x65   : > { %2368 = vmatmul.mubr.msk.f32.gmra.mrb[24].mxu0 %vm328_vm0, %v289_v35  ;;  %2453 = vmatpush1.bf16.msra.mxu1 %v2452_v50  ;;  %v270_v35 = vld [vmem:[%s4033_s5] ss:$8 sm:$0x3] }
  0x66   : > { %567 = vmatprep.mubr.f32.mxu0 %v2800_v0  ;;  %2455 = vmatprep.subr.bf16.mxu1 %v2454_v51  ;;  %v3268_v44 = vrot.slane %v270_v35, %v3250_v36  ;;  %v2478_v51 = vpack.c.bf16 %v1161_v47, %v1159_v46  ;;  %v1180_v46 = vld [vmem:[%s4031_s3 + $0x130] sm:$0xff] }
  0x69   : > { %2369 = vmatmul.mubr.msk.f32.gmra.mrb[26].mxu0 %vm328_vm0, %v290_v42  ;;  %2457 = vmatpush1.bf16.msra.mxu1 %v2456_v61  ;;  %v3265_v42 = vrot.slane %v270_v35, %v3245_v34  ;;  %v1164_v61 = vld [vmem:[%s4031_s3 + $0xb0] sm:$0xff] }
  0x6a   : > { %573 = vmatprep.mubr.f32.mxu0 %v2800_v0  ;;  %2459 = vmatprep.subr.bf16.mxu1 %v2458_v1 }
  0x6d   : > { %2370 = vmatmul.mubr.msk.f32.gmra.mrb[28].mxu0 %vm328_vm0, %v291_v49  ;;  %2461 = vmatpush1.bf16.msra.mxu1 %v2460_v5  ;;  %v2486_v5 = vpack.c.bf16 %v1169_v63, %v1167_v62 }
  0x6e   : > { %579 = vmatprep.mubr.f32.mxu0 %v2800_v0 }
  0x71   : > { %2371 = vmatmul.mubr.msk.f32.gmra.mrb[30].mxu0 %vm328_vm0, %v292_v52  ;;  %v1160_v52 = vld [vmem:[%s4031_s3 + $0x90] sm:$0xff] }
  0x72   : > { %585 = vmatprep.mubr.f32.mxu0 %v2800_v0 }
  0x75   : > { %2372 = vmatmul.mubr.msk.f32.gmra.mrb[32].mxu0 %vm328_vm0, %v293_v53 }
  0x76   : > { %591 = vmatprep.mubr.f32.mxu0 %v2800_v0 }
  0x79   : > { %2373 = vmatmul.mubr.msk.f32.gmra.mrb[34].mxu0 %vm328_vm0, %v294_v54  ;;  %v2480_v54 = vpack.c.bf16 %v1160_v52, %v1158_v48  ;;  %v1183_v48 = vld [vmem:[%s4031_s3 + $0x148] sm:$0xff] }
  0x7a   : > { %597 = vmatprep.mubr.f32.mxu0 %v2800_v0 }
  0x7d   : > { %2374 = vmatmul.mubr.msk.f32.gmra.mrb[36].mxu0 %vm328_vm0, %v295_v55  ;;  %v1163_v55 = vld [vmem:[%s4031_s3 + $0xa8] sm:$0xff] }
  0x7e   : > { %603 = vmatprep.mubr.f32.mxu0 %v2800_v0 }
  0x81   : > { %2375 = vmatmul.mubr.msk.f32.gmra.mrb[38].mxu0 %vm328_vm0, %v296_v56  ;;  %v1165_v56 = vld [vmem:[%s4031_s3 + $0xb8] sm:$0xff] }
  0x82   : > { %609 = vmatprep.mubr.f32.mxu0 %v2800_v0 }
  0x85   : > { %2376 = vmatmul.mubr.msk.f32.gmra.mrb[40].mxu0 %vm328_vm0, %v297_v57  ;;  %v1162_v57 = vld [vmem:[%s4031_s3 + $0xa0] sm:$0xff] }
  0x86   : > { %615 = vmatprep.mubr.f32.mxu0 %v2800_v0 }
  0x89   : > { %2377 = vmatmul.mubr.msk.f32.gmra.mrb[42].mxu0 %vm328_vm0, %v298_v60  ;;  %v2482_v60 = vpack.c.bf16 %v1165_v56, %v1163_v55 }
  0x8a   : > { %621 = vmatprep.mubr.f32.mxu0 %v2800_v0 }
  0x8d   : > { %2378 = vmatmul.mubr.msk.f32.gmra.mrb[44].mxu0 %vm328_vm0, %v299_v4  ;;  %v2484_v4 = vpack.c.bf16 %v1164_v61, %v1162_v57  ;;  %v1182_v57 = vld [vmem:[%s4031_s3 + $0x140] sm:$0xff]  ;;  %v1189_v61 = vld [vmem:[%s4031_s3 + $0x178] sm:$0xff] }
  0x8e   : > { %627 = vmatprep.mubr.f32.mxu0 %v2800_v0 }
  0x91   : > { %2379 = vmatmul.mubr.msk.f32.gmra.mrb[46].mxu0 %vm328_vm0, %v300_v6  ;;  %v1166_v6 = vld [vmem:[%s4031_s3 + $0xc0] sm:$0xff] }
  0x92   : > { %633 = vmatprep.mubr.f32.mxu0 %v2800_v0 }
  0x95   : > { %2380 = vmatmul.mubr.msk.f32.gmra.mrb[48].mxu0 %vm328_vm0, %v301_v7  ;;  %v1168_v7 = vld [vmem:[%s4031_s3 + $0xd0] sm:$0xff] }
  0x96   : > { %639 = vmatprep.mubr.f32.mxu0 %v2800_v0 }
  0x99   : > { %2381 = vmatmul.mubr.msk.f32.gmra.mrb[50].mxu0 %vm328_vm0, %v302_v8 }
  0x9a   : > { %645 = vmatprep.mubr.f32.mxu0 %v2800_v0 }
  0x9d   : > { %2382 = vmatmul.mubr.msk.f32.gmra.mrb[52].mxu0 %vm328_vm0, %v303_v9  ;;  %v1171_v9 = vld [vmem:[%s4031_s3 + $0xe8] sm:$0xff] }
  0x9e   : > { %651 = vmatprep.mubr.f32.mxu0 %v2800_v0 }
  0xa1   : > { %2383 = vmatmul.mubr.msk.f32.gmra.mrb[54].mxu0 %vm328_vm0, %v304_v10  ;;  %v1173_v10 = vld [vmem:[%s4031_s3 + $0xf8] sm:$0xff] }
  0xa2   : > { %657 = vmatprep.mubr.f32.mxu0 %v2800_v0  ;;  %v2490_v17 = vpack.c.bf16 %v1173_v10, %v1171_v9  ;;  %v1191_v9 = vld [vmem:[%s4031_s3 + $0x188] sm:$0xff]  ;;  %v1193_v10 = vld [vmem:[%s4031_s3 + $0x198] sm:$0xff] }
  0xa5   : > { %2384 = vmatmul.mubr.msk.f32.gmra.mrb[56].mxu0 %vm328_vm0, %v305_v11 }
  0xa6   : > { %663 = vmatprep.mubr.f32.mxu0 %v2800_v0 }
  0xa9   : > { %2385 = vmatmul.mubr.msk.f32.gmra.mrb[58].mxu0 %vm328_vm0, %v306_v12 }
  0xaa   : > { %669 = vmatprep.mubr.f32.mxu0 %v2800_v0 }
  0xad   : > { %2386 = vmatmul.mubr.msk.f32.gmra.mrb[60].mxu0 %vm328_vm0, %v307_v13  ;;  %v2488_v13 = vpack.c.bf16 %v1168_v7, %v1166_v6  ;;  %v1186_v6 = vld [vmem:[%s4031_s3 + $0x160] sm:$0xff]  ;;  %v1188_v7 = vld [vmem:[%s4031_s3 + $0x170] sm:$0xff] }
  0xae   : > { %675 = vmatprep.mubr.f32.mxu0 %v2800_v0  ;;  %v1144_v0 = vld [vmem:[%s4031_s3 + $0x10] sm:$0xff] }
  0xaf   : > { %v2464_v19 = vpack.c.bf16 %v1144_v0, %v1142_v18  ;;  %v1170_v18 = vld [vmem:[%s4031_s3 + $0xe0] sm:$0xff]  ;;  %v1172_v0 = vld [vmem:[%s4031_s3 + $0xf0] sm:$0xff] }
  0xb0   : > { %v2492_v24 = vpack.c.bf16 %v1172_v0, %v1170_v18  ;;  %v1190_v18 = vld [vmem:[%s4031_s3 + $0x180] sm:$0xff]  ;;  %v1192_v0 = vld [vmem:[%s4031_s3 + $0x190] sm:$0xff] }
  0xb1   : > { %2387 = vmatmul.mubr.msk.f32.gmra.mrb[62].mxu0 %vm328_vm0, %v308_v14 }
  0xb2   : > { %2465 = vmatpush1.bf16.msra.mxu0 %v2464_v19 }
  0xb3   : > { %2467 = vmatprep.subr.bf16.mxu0 %v2466_v22 }
  0xb6   : > { %2469 = vmatpush1.bf16.msra.mxu0 %v2468_v25 }
  0xb7   : > { %2471 = vmatprep.subr.bf16.mxu0 %v2470_v29  ;;  %v1174_v29 = vld [vmem:[%s4031_s3 + $0x100] sm:$0xff] }
  0xb8   : > { %v2496_v38 = vpack.c.bf16 %v1176_v30, %v1174_v29  ;;  %v1194_v29 = vld [vmem:[%s4031_s3 + $0x1a0] sm:$0xff]  ;;  %v1196_v30 = vld [vmem:[%s4031_s3 + $0x1b0] sm:$0xff] }
  0xba   : > { %2473 = vmatpush1.bf16.msra.mxu0 %v2472_v33  ;;  %v1181_v33 = vld [vmem:[%s4031_s3 + $0x138] sm:$0xff] }
  0xbb   : > { %2475 = vmatprep.subr.bf16.mxu0 %v2474_v39 }
  0xbe   : > { %2477 = vmatpush1.bf16.msra.mxu0 %v2476_v43  ;;  %v2498_v43 = vpack.c.bf16 %v1181_v33, %v1179_v32  ;;  %v1199_v32 = vld [vmem:[%s4031_s3 + $0x1c8] sm:$0xff]  ;;  %v1201_v33 = vld [vmem:[%s4031_s3 + $0x1d8] sm:$0xff] }
  0xbf   : > { %2479 = vmatprep.subr.bf16.mxu0 %v2478_v51 }
  0xc2   : > { %2481 = vmatpush1.bf16.msra.mxu0 %v2480_v54 }
  0xc3   : > { %2483 = vmatprep.subr.bf16.mxu0 %v2482_v60  ;;  %v1187_v60 = vld [vmem:[%s4031_s3 + $0x168] sm:$0xff] }
  0xc6   : > { %2485 = vmatpush1.bf16.msra.mxu0 %v2484_v4 }
  0xc7   : > { %2487 = vmatprep.subr.bf16.mxu0 %v2486_v5  ;;  %v2506_v5 = vpack.c.bf16 %v1189_v61, %v1187_v60 }
  0xca   : > { %2489 = vmatpush1.bf16.msra.mxu0 %v2488_v13  ;;  %v2508_v13 = vpack.c.bf16 %v1188_v7, %v1186_v6 }
  0xcb   : > { %2491 = vmatprep.subr.bf16.mxu0 %v2490_v17  ;;  %v2510_v17 = vpack.c.bf16 %v1193_v10, %v1191_v9 }
  0xce   : > { %2493 = vmatpush1.bf16.msra.mxu0 %v2492_v24  ;;  %v2512_v24 = vpack.c.bf16 %v1192_v0, %v1190_v18 }
  0xcf   : > { %2495 = vmatprep.subr.bf16.mxu0 %v2494_v28  ;;  %v2514_v28 = vpack.c.bf16 %v1197_v21, %v1195_v20 }
  0xd2   : > { %2497 = vmatpush1.bf16.msra.mxu0 %v2496_v38  ;;  %v2516_v38 = vpack.c.bf16 %v1196_v30, %v1194_v29 }
  0xd3   : > { %2499 = vmatprep.subr.bf16.mxu0 %v2498_v43  ;;  %v2518_v43 = vpack.c.bf16 %v1201_v33, %v1199_v32 }
 0x108   : > { %v491_v45 = vpop.f32.mrb[0].mxu0 }
 0x109   : > { %v492_v49 = vadd.f32 %v491_v45, %v3265_v42  ;;  %v493_v50 = vpop.f32.mrb[1].mxu0  ;;  %v1178_v45 = vld [vmem:[%s4031_s3 + $0x120] sm:$0xff] }
 0x10a   : > { %v494_v53 = vadd.f32 %v493_v50, %v3268_v44  ;;  %v2500_v52 = vpack.c.bf16 %v1180_v46, %v1178_v45  ;;  %v1198_v45 = vld [vmem:[%s4031_s3 + $0x1c0] sm:$0xff]  ;;  %v1200_v46 = vld [vmem:[%s4031_s3 + $0x1d0] sm:$0xff] }
 0x10b   : > { %v682_v1 = vmax.f32 %v492_v49, 0.0  ;;  %v1185_v49 = vld [vmem:[%s4031_s3 + $0x158] sm:$0xff] }
 0x10c   : > { %v497_v58 = vpop.f32.mrb[2].mxu0  ;;  %v683_v59 = vmax.f32 %v494_v53, 0.0  ;;  %v2502_v56 = vpack.c.bf16 %v1185_v49, %v1183_v48  ;;  %2501 = vmatpush1.bf16.msra.mxu0 %v2500_v52  ;;  %v1203_v48 = vld [vmem:[%s4031_s3 + $0x1e8] sm:$0xff]  ;;  %v1205_v49 = vld [vmem:[%s4031_s3 + $0x1f8] sm:$0xff]  ;;  %v2520_v52 = vpack.c.bf16 %v1200_v46, %v1198_v45 }
 0x10d   : > { %v498_v2 = vadd.f32 %v497_v58, %v3265_v42  ;;  %v499_v3 = vpop.f32.mrb[3].mxu0  ;;  %v1184_v58 = vld [vmem:[%s4031_s3 + $0x150] sm:$0xff] }
 0x10e   : > { %v500_v8 = vadd.f32 %v499_v3, %v3268_v44  ;;  %885 = vmatprep.mubr.f32.mxu1 %v683_v59  ;;  %2503 = vmatprep.subr.bf16.mxu0 %v2502_v56  ;;  %v2522_v56 = vpack.c.bf16 %v1205_v49, %v1203_v48 }
 0x10f   : > { %886 = vmatmul.mubr.f32.vlgmr.msra.gmra.mrb[0].mxu1 %v682_v1  ;;  %v684_v14 = vmax.f32 %v498_v2, 0.0  ;;  %v2504_v1 = vpack.c.bf16 %v1184_v58, %v1182_v57  ;;  %v1202_v57 = vld [vmem:[%s4031_s3 + $0x1e0] sm:$0xff]  ;;  %v1204_v58 = vld [vmem:[%s4031_s3 + $0x1f0] sm:$0xff] }
 0x110   : > { %v685_v11 = vmax.f32 %v500_v8, 0.0  ;;  %v503_v12 = vpop.f32.mrb[4].mxu0 }
 0x111   : > { %v504_v15 = vadd.f32 %v503_v12, %v3265_v42  ;;  %v505_v16 = vpop.f32.mrb[5].mxu0  ;;  %2505 = vmatpush1.bf16.msra.mxu0 %v2504_v1 }
 0x112   : > { %v506_v19 = vadd.f32 %v505_v16, %v3268_v44  ;;  %891 = vmatprep.mubr.f32.mxu1 %v685_v11  ;;  %2507 = vmatprep.subr.bf16.mxu0 %v2506_v5 }
 0x113   : > { %892 = vmatmul.mubr.f32.gmra.mrb[2].mxu1 %v684_v14  ;;  %v686_v25 = vmax.f32 %v504_v15, 0.0 }
 0x114   : > { %v687_v22 = vmax.f32 %v506_v19, 0.0  ;;  %v509_v23 = vpop.f32.mrb[6].mxu0 }
 0x115   : > { %v510_v26 = vadd.f32 %v509_v23, %v3265_v42  ;;  %v511_v27 = vpop.f32.mrb[7].mxu0  ;;  %2509 = vmatpush1.bf16.msra.mxu0 %v2508_v13 }
 0x116   : > { %v512_v31 = vadd.f32 %v511_v27, %v3268_v44  ;;  %897 = vmatprep.mubr.f32.mxu1 %v687_v22  ;;  %2511 = vmatprep.subr.bf16.mxu0 %v2510_v17 }
 0x117   : > { %898 = vmatmul.mubr.f32.gmra.mrb[4].mxu1 %v686_v25  ;;  %v688_v39 = vmax.f32 %v510_v26, 0.0 }
 0x118   : > { %v689_v35 = vmax.f32 %v512_v31, 0.0  ;;  %v515_v37 = vpop.f32.mrb[8].mxu0 }
 0x119   : > { %v516_v40 = vadd.f32 %v515_v37, %v3265_v42  ;;  %v517_v41 = vpop.f32.mrb[9].mxu0  ;;  %2513 = vmatpush1.bf16.msra.mxu0 %v2512_v24 }
 0x11a   : > { %v518_v47 = vadd.f32 %v517_v41, %v3268_v44  ;;  %903 = vmatprep.mubr.f32.mxu1 %v689_v35  ;;  %2515 = vmatprep.subr.bf16.mxu0 %v2514_v28 }
 0x11b   : > { %904 = vmatmul.mubr.f32.gmra.mrb[6].mxu1 %v688_v39  ;;  %v690_v53 = vmax.f32 %v516_v40, 0.0 }
 0x11c   : > { %v691_v50 = vmax.f32 %v518_v47, 0.0  ;;  %v521_v51 = vpop.f32.mrb[10].mxu0 }
 0x11d   : > { %v522_v54 = vadd.f32 %v521_v51, %v3265_v42  ;;  %v523_v55 = vpop.f32.mrb[11].mxu0  ;;  %2517 = vmatpush1.bf16.msra.mxu0 %v2516_v38 }
 0x11e   : > { %v524_v59 = vadd.f32 %v523_v55, %v3268_v44  ;;  %909 = vmatprep.mubr.f32.mxu1 %v691_v50  ;;  %2519 = vmatprep.subr.bf16.mxu0 %v2518_v43 }
 0x11f   : > { %910 = vmatmul.mubr.f32.gmra.mrb[8].mxu1 %v690_v53  ;;  %v692_v2 = vmax.f32 %v522_v54, 0.0 }
 0x120   : > { %v693_v62 = vmax.f32 %v524_v59, 0.0  ;;  %v527_v63 = vpop.f32.mrb[12].mxu0 }
 0x121   : > { %v528_v3 = vadd.f32 %v527_v63, %v3265_v42  ;;  %v529_v4 = vpop.f32.mrb[13].mxu0  ;;  %2521 = vmatpush1.bf16.msra.mxu0 %v2520_v52 }
 0x122   : > { %v530_v8 = vadd.f32 %v529_v4, %v3268_v44  ;;  %915 = vmatprep.mubr.f32.mxu1 %v693_v62  ;;  %v2524_v62 = vpack.c.bf16 %v1204_v58, %v1202_v57  ;;  %2523 = vmatprep.subr.bf16.mxu0 %v2522_v56 }
 0x123   : > { %916 = vmatmul.mubr.f32.gmra.mrb[10].mxu1 %v692_v2  ;;  %v694_v14 = vmax.f32 %v528_v3, 0.0 }
 0x124   : > { %v695_v11 = vmax.f32 %v530_v8, 0.0  ;;  %v533_v12 = vpop.f32.mrb[14].mxu0 }
 0x125   : > { %v534_v15 = vadd.f32 %v533_v12, %v3265_v42  ;;  %v535_v16 = vpop.f32.mrb[15].mxu0  ;;  %2525 = vmatpush1.bf16.msra.mxu0 %v2524_v62 }
 0x126   : > { %v536_v19 = vadd.f32 %v535_v16, %v3268_v44  ;;  %921 = vmatprep.mubr.f32.mxu1 %v695_v11 }
 0x127   : > { %922 = vmatmul.mubr.f32.gmra.mrb[12].mxu1 %v694_v14  ;;  %v696_v25 = vmax.f32 %v534_v15, 0.0 }
 0x128   : > { %v697_v22 = vmax.f32 %v536_v19, 0.0  ;;  %v539_v23 = vpop.f32.mrb[16].mxu0 }
 0x129   : > { %v540_v26 = vadd.f32 %v539_v23, %v3265_v42  ;;  %v541_v27 = vpop.f32.mrb[17].mxu0 }
 0x12a   : > { %v542_v31 = vadd.f32 %v541_v27, %v3268_v44  ;;  %927 = vmatprep.mubr.f32.mxu1 %v697_v22 }
 0x12b   : > { %928 = vmatmul.mubr.f32.gmra.mrb[14].mxu1 %v696_v25  ;;  %v698_v39 = vmax.f32 %v540_v26, 0.0 }
 0x12c   : > { %v699_v35 = vmax.f32 %v542_v31, 0.0  ;;  %v545_v37 = vpop.f32.mrb[18].mxu0 }
 0x12d   : > { %v546_v40 = vadd.f32 %v545_v37, %v3265_v42  ;;  %v547_v41 = vpop.f32.mrb[19].mxu0 }
 0x12e   : > { %v548_v47 = vadd.f32 %v547_v41, %v3268_v44  ;;  %933 = vmatprep.mubr.f32.mxu1 %v699_v35 }
 0x12f   : > { %934 = vmatmul.mubr.f32.gmra.mrb[16].mxu1 %v698_v39  ;;  %v700_v53 = vmax.f32 %v546_v40, 0.0 }
 0x130   : > { %v701_v50 = vmax.f32 %v548_v47, 0.0  ;;  %v551_v51 = vpop.f32.mrb[20].mxu0 }
 0x131   : > { %v552_v54 = vadd.f32 %v551_v51, %v3265_v42  ;;  %v553_v55 = vpop.f32.mrb[21].mxu0 }
 0x132   : > { %v554_v59 = vadd.f32 %v553_v55, %v3268_v44  ;;  %939 = vmatprep.mubr.f32.mxu1 %v701_v50 }
 0x133   : > { %940 = vmatmul.mubr.f32.gmra.mrb[18].mxu1 %v700_v53  ;;  %v702_v63 = vmax.f32 %v552_v54, 0.0 }
 0x134   : > { %v703_v60 = vmax.f32 %v554_v59, 0.0  ;;  %v557_v61 = vpop.f32.mrb[22].mxu0 }
 0x135   : > { %v558_v1 = vadd.f32 %v557_v61, %v3265_v42  ;;  %v559_v2 = vpop.f32.mrb[23].mxu0 }
 0x136   : > { %v560_v3 = vadd.f32 %v559_v2, %v3268_v44  ;;  %945 = vmatprep.mubr.f32.mxu1 %v703_v60 }
 0x137   : > { %946 = vmatmul.mubr.f32.gmra.mrb[20].mxu1 %v702_v63  ;;  %v704_v6 = vmax.f32 %v558_v1, 0.0 }
 0x138   : > { %v705_v4 = vmax.f32 %v560_v3, 0.0  ;;  %v563_v5 = vpop.f32.mrb[24].mxu0 }
 0x139   : > { %v564_v7 = vadd.f32 %v563_v5, %v3265_v42  ;;  %v565_v8 = vpop.f32.mrb[25].mxu0 }
 0x13a   : > { %v566_v9 = vadd.f32 %v565_v8, %v3268_v44  ;;  %951 = vmatprep.mubr.f32.mxu1 %v705_v4 }
 0x13b   : > { %952 = vmatmul.mubr.f32.gmra.mrb[22].mxu1 %v704_v6  ;;  %v706_v12 = vmax.f32 %v564_v7, 0.0 }
 0x13c   : > { %v707_v10 = vmax.f32 %v566_v9, 0.0  ;;  %v569_v11 = vpop.f32.mrb[26].mxu0 }
 0x13d   : > { %v570_v13 = vadd.f32 %v569_v11, %v3265_v42  ;;  %v571_v14 = vpop.f32.mrb[27].mxu0 }
 0x13e   : > { %v572_v15 = vadd.f32 %v571_v14, %v3268_v44  ;;  %957 = vmatprep.mubr.f32.mxu1 %v707_v10 }
 0x13f   : > { %958 = vmatmul.mubr.f32.gmra.mrb[24].mxu1 %v706_v12  ;;  %v708_v18 = vmax.f32 %v570_v13, 0.0 }
 0x140   : > { %v709_v16 = vmax.f32 %v572_v15, 0.0  ;;  %v575_v17 = vpop.f32.mrb[28].mxu0 }
 0x141   : > { %v576_v0 = vadd.f32 %v575_v17, %v3265_v42  ;;  %v577_v19 = vpop.f32.mrb[29].mxu0 }
 0x142   : > { %v578_v20 = vadd.f32 %v577_v19, %v3268_v44  ;;  %963 = vmatprep.mubr.f32.mxu1 %v709_v16 }
 0x143   : > { %964 = vmatmul.mubr.f32.gmra.mrb[26].mxu1 %v708_v18  ;;  %v710_v23 = vmax.f32 %v576_v0, 0.0 }
 0x144   : > { %v711_v21 = vmax.f32 %v578_v20, 0.0  ;;  %v581_v22 = vpop.f32.mrb[30].mxu0 }
 0x145   : > { %v582_v24 = vadd.f32 %v581_v22, %v3265_v42  ;;  %v583_v25 = vpop.f32.mrb[31].mxu0 }
 0x146   : > { %v584_v26 = vadd.f32 %v583_v25, %v3268_v44  ;;  %969 = vmatprep.mubr.f32.mxu1 %v711_v21 }
 0x147   : > { %970 = vmatmul.mubr.f32.gmra.mrb[28].mxu1 %v710_v23  ;;  %v712_v29 = vmax.f32 %v582_v24, 0.0 }
 0x148   : > { %v713_v27 = vmax.f32 %v584_v26, 0.0  ;;  %v587_v28 = vpop.f32.mrb[32].mxu0 }
 0x149   : > { %v588_v30 = vadd.f32 %v587_v28, %v3265_v42  ;;  %v589_v31 = vpop.f32.mrb[33].mxu0 }
 0x14a   : > { %v590_v32 = vadd.f32 %v589_v31, %v3268_v44  ;;  %975 = vmatprep.mubr.f32.mxu1 %v713_v27 }
 0x14b   : > { %976 = vmatmul.mubr.f32.gmra.mrb[30].mxu1 %v712_v29  ;;  %v714_v37 = vmax.f32 %v588_v30, 0.0 }
 0x14c   : > { %v715_v33 = vmax.f32 %v590_v32, 0.0  ;;  %v593_v35 = vpop.f32.mrb[34].mxu0 }
 0x14d   : > { %v594_v38 = vadd.f32 %v593_v35, %v3265_v42  ;;  %v595_v39 = vpop.f32.mrb[35].mxu0 }
 0x14e   : > { %v596_v40 = vadd.f32 %v595_v39, %v3268_v44  ;;  %981 = vmatprep.mubr.f32.mxu1 %v715_v33 }
 0x14f   : > { %982 = vmatmul.mubr.f32.gmra.mrb[32].mxu1 %v714_v37  ;;  %v716_v45 = vmax.f32 %v594_v38, 0.0 }
 0x150   : > { %v717_v41 = vmax.f32 %v596_v40, 0.0  ;;  %v599_v43 = vpop.f32.mrb[36].mxu0 }
 0x151   : > { %v600_v46 = vadd.f32 %v599_v43, %v3265_v42  ;;  %v601_v47 = vpop.f32.mrb[37].mxu0 }
 0x152   : > { %v602_v48 = vadd.f32 %v601_v47, %v3268_v44  ;;  %987 = vmatprep.mubr.f32.mxu1 %v717_v41 }
 0x153   : > { %988 = vmatmul.mubr.f32.gmra.mrb[34].mxu1 %v716_v45  ;;  %v718_v51 = vmax.f32 %v600_v46, 0.0 }
 0x154   : > { %v719_v49 = vmax.f32 %v602_v48, 0.0  ;;  %v605_v50 = vpop.f32.mrb[38].mxu0 }
 0x155   : > { %v606_v52 = vadd.f32 %v605_v50, %v3265_v42  ;;  %v607_v53 = vpop.f32.mrb[39].mxu0 }
 0x156   : > { %v608_v54 = vadd.f32 %v607_v53, %v3268_v44  ;;  %993 = vmatprep.mubr.f32.mxu1 %v719_v49 }
 0x157   : > { %994 = vmatmul.mubr.f32.gmra.mrb[36].mxu1 %v718_v51  ;;  %v720_v57 = vmax.f32 %v606_v52, 0.0 }
 0x158   : > { %v721_v55 = vmax.f32 %v608_v54, 0.0  ;;  %v611_v56 = vpop.f32.mrb[40].mxu0 }
 0x159   : > { %v612_v58 = vadd.f32 %v611_v56, %v3265_v42  ;;  %v613_v59 = vpop.f32.mrb[41].mxu0 }
 0x15a   : > { %v614_v60 = vadd.f32 %v613_v59, %v3268_v44  ;;  %999 = vmatprep.mubr.f32.mxu1 %v721_v55 }
 0x15b   : > { %1000 = vmatmul.mubr.f32.gmra.mrb[38].mxu1 %v720_v57  ;;  %v722_v63 = vmax.f32 %v612_v58, 0.0 }
 0x15c   : > { %v723_v61 = vmax.f32 %v614_v60, 0.0  ;;  %v617_v62 = vpop.f32.mrb[42].mxu0 }
 0x15d   : > { %v618_v1 = vadd.f32 %v617_v62, %v3265_v42  ;;  %v619_v2 = vpop.f32.mrb[43].mxu0 }
 0x15e   : > { %v620_v3 = vadd.f32 %v619_v2, %v3268_v44  ;;  %1005 = vmatprep.mubr.f32.mxu1 %v723_v61 }
 0x15f   : > { %1006 = vmatmul.mubr.f32.gmra.mrb[40].mxu1 %v722_v63  ;;  %v724_v6 = vmax.f32 %v618_v1, 0.0 }
 0x160   : > { %v725_v4 = vmax.f32 %v620_v3, 0.0  ;;  %v623_v5 = vpop.f32.mrb[44].mxu0 }
 0x161   : > { %v624_v7 = vadd.f32 %v623_v5, %v3265_v42  ;;  %v625_v8 = vpop.f32.mrb[45].mxu0 }
 0x162   : > { %v626_v9 = vadd.f32 %v625_v8, %v3268_v44  ;;  %1011 = vmatprep.mubr.f32.mxu1 %v725_v4 }
 0x163   : > { %1012 = vmatmul.mubr.f32.gmra.mrb[42].mxu1 %v724_v6  ;;  %v726_v12 = vmax.f32 %v624_v7, 0.0  ;;  %v2354_v6 = vld [vmem:[%s4033_s5 + $0x1] ss:$8 sm:$0x3] }
 0x164   : > { %v727_v10 = vmax.f32 %v626_v9, 0.0  ;;  %v629_v11 = vpop.f32.mrb[46].mxu0  ;;  %v3482_v7 = vrot.slane %v2354_v6, %v3245_v34  ;;  %v3485_v8 = vrot.slane %v2354_v6, %v3250_v36  ;;  %v2801_v9 = vmov 0.0|0.0  }
 0x165   : > { %v630_v13 = vadd.f32 %v629_v11, %v3265_v42  ;;  %v631_v14 = vpop.f32.mrb[47].mxu0  ;;  %2574 = vmatprep.subr.bf16.mxu1 %v2801_v9  ;;  %2526 = vmatprep.subr.bf16.mxu0 %v2801_v9 }
 0x166   : > { %v632_v15 = vadd.f32 %v631_v14, %v3268_v44  ;;  %1017 = vmatprep.mubr.f32.mxu1 %v727_v10  ;;  %v1539_v10 = vld [vmem:[#allocation2 + $0x8] sm:$0xff] }
 0x167   : > { %1018 = vmatmul.mubr.f32.gmra.mrb[44].mxu1 %v726_v12  ;;  %v728_v18 = vmax.f32 %v630_v13, 0.0 }
 0x168   : > { %v729_v16 = vmax.f32 %v632_v15, 0.0  ;;  %v635_v17 = vpop.f32.mrb[48].mxu0  ;;  %v1540_v15 = vld [vmem:[#allocation2 + $0x10] sm:$0xff] }
 0x169   : > { %v636_v0 = vadd.f32 %v635_v17, %v3265_v42  ;;  %v637_v19 = vpop.f32.mrb[49].mxu0 }
 0x16a   : > { %v638_v20 = vadd.f32 %v637_v19, %v3268_v44  ;;  %1023 = vmatprep.mubr.f32.mxu1 %v729_v16  ;;  %v1541_v16 = vld [vmem:[#allocation2 + $0x18] sm:$0xff] }
 0x16b   : > { %1024 = vmatmul.mubr.f32.gmra.mrb[46].mxu1 %v728_v18  ;;  %v730_v23 = vmax.f32 %v636_v0, 0.0 }
 0x16c   : > { %v731_v21 = vmax.f32 %v638_v20, 0.0  ;;  %v641_v22 = vpop.f32.mrb[50].mxu0 }
 0x16d   : > { %v642_v24 = vadd.f32 %v641_v22, %v3265_v42  ;;  %v643_v25 = vpop.f32.mrb[51].mxu0 }
 0x16e   : > { %v644_v26 = vadd.f32 %v643_v25, %v3268_v44  ;;  %1029 = vmatprep.mubr.f32.mxu1 %v731_v21  ;;  %v2530_v21 = vpack.c.bf16 %v1541_v16, %v1540_v15 }
 0x16f   : > { %1030 = vmatmul.mubr.f32.gmra.mrb[48].mxu1 %v730_v23  ;;  %v732_v29 = vmax.f32 %v642_v24, 0.0  ;;  %v1542_v23 = vld [vmem:[#allocation2 + $0x20] sm:$0xff]  ;;  %v1543_v24 = vld [vmem:[#allocation2 + $0x28] sm:$0xff] }
 0x170   : > { %v733_v27 = vmax.f32 %v644_v26, 0.0  ;;  %v647_v28 = vpop.f32.mrb[52].mxu0 }
 0x171   : > { %v648_v30 = vadd.f32 %v647_v28, %v3265_v42  ;;  %v649_v31 = vpop.f32.mrb[53].mxu0 }
 0x172   : > { %v650_v32 = vadd.f32 %v649_v31, %v3268_v44  ;;  %1035 = vmatprep.mubr.f32.mxu1 %v733_v27 }
 0x173   : > { %1036 = vmatmul.mubr.f32.gmra.mrb[50].mxu1 %v732_v29  ;;  %v734_v37 = vmax.f32 %v648_v30, 0.0  ;;  %v2533_v30 = vpack.c.bf16 %v1543_v24, %v1542_v23 }
 0x174   : > { %v735_v33 = vmax.f32 %v650_v32, 0.0  ;;  %v653_v35 = vpop.f32.mrb[54].mxu0  ;;  %v1544_v32 = vld [vmem:[#allocation2 + $0x30] sm:$0xff] }
 0x175   : > { %v654_v38 = vadd.f32 %v653_v35, %v3265_v42  ;;  %v655_v39 = vpop.f32.mrb[55].mxu0 }
 0x176   : > { %v656_v40 = vadd.f32 %v655_v39, %v3268_v44  ;;  %1041 = vmatprep.mubr.f32.mxu1 %v735_v33  ;;  %v1545_v33 = vld [vmem:[#allocation2 + $0x38] sm:$0xff] }
 0x177   : > { %1042 = vmatmul.mubr.f32.gmra.mrb[52].mxu1 %v734_v37  ;;  %v736_v45 = vmax.f32 %v654_v38, 0.0 }
 0x178   : > { %v737_v41 = vmax.f32 %v656_v40, 0.0  ;;  %v659_v43 = vpop.f32.mrb[56].mxu0 }
 0x179   : > { %v660_v46 = vadd.f32 %v659_v43, %v3265_v42  ;;  %v661_v47 = vpop.f32.mrb[57].mxu0 }
 0x17a   : > { %v662_v48 = vadd.f32 %v661_v47, %v3268_v44  ;;  %1047 = vmatprep.mubr.f32.mxu1 %v737_v41  ;;  %v2536_v41 = vpack.c.bf16 %v1545_v33, %v1544_v32 }
 0x17b   : > { %1048 = vmatmul.mubr.f32.gmra.mrb[54].mxu1 %v736_v45  ;;  %v738_v51 = vmax.f32 %v660_v46, 0.0  ;;  %v1546_v45 = vld [vmem:[#allocation2 + $0x40] sm:$0xff]  ;;  %v1547_v46 = vld [vmem:[#allocation2 + $0x48] sm:$0xff] }
 0x17c   : > { %v739_v49 = vmax.f32 %v662_v48, 0.0  ;;  %v665_v50 = vpop.f32.mrb[58].mxu0 }
 0x17d   : > { %v666_v52 = vadd.f32 %v665_v50, %v3265_v42  ;;  %v667_v53 = vpop.f32.mrb[59].mxu0 }
 0x17e   : > { %v668_v54 = vadd.f32 %v667_v53, %v3268_v44  ;;  %1053 = vmatprep.mubr.f32.mxu1 %v739_v49 }
 0x17f   : > { %1054 = vmatmul.mubr.f32.gmra.mrb[56].mxu1 %v738_v51  ;;  %v740_v57 = vmax.f32 %v666_v52, 0.0  ;;  %v2539_v52 = vpack.c.bf16 %v1547_v46, %v1546_v45 }
 0x180   : > { %v741_v55 = vmax.f32 %v668_v54, 0.0  ;;  %v671_v56 = vpop.f32.mrb[60].mxu0  ;;  %v1548_v54 = vld [vmem:[#allocation2 + $0x50] sm:$0xff] }
 0x181   : > { %v672_v58 = vadd.f32 %v671_v56, %v3265_v42  ;;  %v673_v59 = vpop.f32.mrb[61].mxu0 }
 0x182   : > { %v674_v60 = vadd.f32 %v673_v59, %v3268_v44  ;;  %1059 = vmatprep.mubr.f32.mxu1 %v741_v55  ;;  %v1549_v55 = vld [vmem:[#allocation2 + $0x58] sm:$0xff] }
 0x183   : > { %1060 = vmatmul.mubr.f32.gmra.mrb[58].mxu1 %v740_v57  ;;  %v742_v63 = vmax.f32 %v672_v58, 0.0 }
 0x184   : > { %v743_v61 = vmax.f32 %v674_v60, 0.0  ;;  %v677_v62 = vpop.f32.mrb[62].mxu0 }
 0x185   : > { %v678_v1 = vadd.f32 %v677_v62, %v3265_v42  ;;  %v679_v2 = vpop.f32.mrb[63].mxu0 }
 0x186   : > { %v680_v3 = vadd.f32 %v679_v2, %v3268_v44  ;;  %1065 = vmatprep.mubr.f32.mxu1 %v743_v61  ;;  %v1538_v44 = vld [vmem:[#allocation2] sm:$0xff]  ;;  %v2542_v61 = vpack.c.bf16 %v1549_v55, %v1548_v54 }
 0x187   : > { %1066 = vmatmul.mubr.f32.gmra.mrb[60].mxu1 %v742_v63  ;;  %v744_v5 = vmax.f32 %v678_v1, 0.0  ;;  %v2527_v13 = vpack.c.bf16 %v1539_v10, %v1538_v44  ;;  %v1550_v63 = vld [vmem:[#allocation2 + $0x60] sm:$0xff]  ;;  %v1551_v1 = vld [vmem:[#allocation2 + $0x68] sm:$0xff]  ;;  %v1552_v10 = vld [vmem:[#allocation2 + $0x70] sm:$0xff] }
 0x188   : > { %v745_v4 = vmax.f32 %v680_v3, 0.0 }
 0x189   : > { %2590 = vmatpush1.bf16.msra.mxu1 %v2527_v13 }
 0x18a   : > { %1071 = vmatprep.mubr.f32.mxu1 %v745_v4  ;;  %2575 = vmatprep.subr.bf16.mxu1 %v2801_v9 }
 0x18b   : > { %1072 = vmatmul.mubr.f32.gmra.mrb[62].mxu1 %v744_v5 }
 0x18d   : > { %2591 = vmatpush1.bf16.msra.mxu1 %v2530_v21 }
 0x18e   : > { %2576 = vmatprep.subr.bf16.mxu1 %v2801_v9 }
 0x191   : > { %2592 = vmatpush1.bf16.msra.mxu1 %v2533_v30 }
 0x192   : > { %2577 = vmatprep.subr.bf16.mxu1 %v2801_v9 }
 0x195   : > { %2593 = vmatpush1.bf16.msra.mxu1 %v2536_v41 }
 0x196   : > { %2578 = vmatprep.subr.bf16.mxu1 %v2801_v9 }
 0x199   : > { %2594 = vmatpush1.bf16.msra.mxu1 %v2539_v52 }
 0x19a   : > { %2579 = vmatprep.subr.bf16.mxu1 %v2801_v9 }
 0x19d   : > { %2595 = vmatpush1.bf16.msra.mxu1 %v2542_v61 }
 0x19e   : > { %2580 = vmatprep.subr.bf16.mxu1 %v2801_v9 }
 0x1e2   : > { %v887_v42 = vpop.f32.mrb[0].mxu1 }
 0x1e3   : > { %v888_v11 = vadd.f32 %v887_v42, %v3482_v7  ;;  %v889_v12 = vpop.f32.mrb[1].mxu1  ;;  %v2545_v42 = vpack.c.bf16 %v1551_v1, %v1550_v63 }
 0x1e4   : > { %v890_v14 = vadd.f32 %v889_v12, %v3485_v8 }
 0x1e5   : > { %v1078_v0 = vmax.f32 %v888_v11, 0.0  ;;  %v1553_v11 = vld [vmem:[#allocation2 + $0x78] sm:$0xff]  ;;  %2596 = vmatpush1.bf16.msra.mxu1 %v2545_v42 }
 0x1e6   : > { %v1079_v17 = vmax.f32 %v890_v14, 0.0  ;;  %v893_v18 = vpop.f32.mrb[2].mxu1  ;;  %2581 = vmatprep.subr.bf16.mxu1 %v2801_v9 }
 0x1e7   : > { %v894_v19 = vadd.f32 %v893_v18, %v3482_v7  ;;  %v895_v20 = vpop.f32.mrb[3].mxu1 }
 0x1e8   : > { %v896_v22 = vadd.f32 %v895_v20, %v3485_v8  ;;  %1281 = vmatprep.mubr.f32.mxu0 %v1079_v17  ;;  %v2548_v17 = vpack.c.bf16 %v1553_v11, %v1552_v10 }
 0x1e9   : > { %1282 = vmatmul.mubr.f32.vlgmr.msra.gmra.mrb[64].mxu0 %v1078_v0  ;;  %v1080_v27 = vmax.f32 %v894_v19, 0.0  ;;  %v1554_v0 = vld [vmem:[#allocation2 + $0x80] sm:$0xff]  ;;  %v1555_v19 = vld [vmem:[#allocation2 + $0x88] sm:$0xff] }
 0x1ea   : > { %v1081_v25 = vmax.f32 %v896_v22, 0.0  ;;  %v899_v26 = vpop.f32.mrb[4].mxu1  ;;  %2528 = vmatpush1.bf16.msra.mxu0 %v2527_v13  ;;  %2597 = vmatpush1.bf16.msra.mxu1 %v2548_v17 }
 0x1eb   : > { %v900_v28 = vadd.f32 %v899_v26, %v3482_v7  ;;  %v901_v29 = vpop.f32.mrb[5].mxu1  ;;  %2529 = vmatprep.subr.bf16.mxu0 %v2801_v9  ;;  %2582 = vmatprep.subr.bf16.mxu1 %v2801_v9 }
 0x1ec   : > { %v902_v31 = vadd.f32 %v901_v29, %v3485_v8  ;;  %1287 = vmatprep.mubr.f32.mxu0 %v1081_v25  ;;  %v2551_v25 = vpack.c.bf16 %v1555_v19, %v1554_v0 }
 0x1ed   : > { %1288 = vmatmul.mubr.f32.gmra.mrb[66].mxu0 %v1080_v27  ;;  %v1082_v38 = vmax.f32 %v900_v28, 0.0  ;;  %v1556_v27 = vld [vmem:[#allocation2 + $0x90] sm:$0xff]  ;;  %v1557_v28 = vld [vmem:[#allocation2 + $0x98] sm:$0xff] }
 0x1ee   : > { %v1083_v35 = vmax.f32 %v902_v31, 0.0  ;;  %v905_v37 = vpop.f32.mrb[6].mxu1  ;;  %2531 = vmatpush1.bf16.msra.mxu0 %v2530_v21  ;;  %2598 = vmatpush1.bf16.msra.mxu1 %v2551_v25 }
 0x1ef   : > { %v906_v39 = vadd.f32 %v905_v37, %v3482_v7  ;;  %v907_v40 = vpop.f32.mrb[7].mxu1  ;;  %2532 = vmatprep.subr.bf16.mxu0 %v2801_v9  ;;  %2583 = vmatprep.subr.bf16.mxu1 %v2801_v9 }
 0x1f0   : > { %v908_v43 = vadd.f32 %v907_v40, %v3485_v8  ;;  %1293 = vmatprep.mubr.f32.mxu0 %v1083_v35  ;;  %v2554_v35 = vpack.c.bf16 %v1557_v28, %v1556_v27 }
 0x1f1   : > { %1294 = vmatmul.mubr.f32.gmra.mrb[68].mxu0 %v1082_v38  ;;  %v1084_v49 = vmax.f32 %v906_v39, 0.0  ;;  %v1558_v38 = vld [vmem:[#allocation2 + $0xa0] sm:$0xff]  ;;  %v1559_v39 = vld [vmem:[#allocation2 + $0xa8] sm:$0xff] }
 0x1f2   : > { %v1085_v47 = vmax.f32 %v908_v43, 0.0  ;;  %v911_v48 = vpop.f32.mrb[8].mxu1  ;;  %2534 = vmatpush1.bf16.msra.mxu0 %v2533_v30  ;;  %2599 = vmatpush1.bf16.msra.mxu1 %v2554_v35 }
 0x1f3   : > { %v912_v50 = vadd.f32 %v911_v48, %v3482_v7  ;;  %v913_v51 = vpop.f32.mrb[9].mxu1  ;;  %2535 = vmatprep.subr.bf16.mxu0 %v2801_v9  ;;  %2584 = vmatprep.subr.bf16.mxu1 %v2801_v9 }
 0x1f4   : > { %v914_v53 = vadd.f32 %v913_v51, %v3485_v8  ;;  %1299 = vmatprep.mubr.f32.mxu0 %v1085_v47  ;;  %v2557_v47 = vpack.c.bf16 %v1559_v39, %v1558_v38 }
 0x1f5   : > { %1300 = vmatmul.mubr.f32.gmra.mrb[70].mxu0 %v1084_v49  ;;  %v1086_v58 = vmax.f32 %v912_v50, 0.0  ;;  %v1560_v49 = vld [vmem:[#allocation2 + $0xb0] sm:$0xff]  ;;  %v1561_v50 = vld [vmem:[#allocation2 + $0xb8] sm:$0xff] }
 0x1f6   : > { %v1087_v56 = vmax.f32 %v914_v53, 0.0  ;;  %v917_v57 = vpop.f32.mrb[10].mxu1  ;;  %2537 = vmatpush1.bf16.msra.mxu0 %v2536_v41  ;;  %2600 = vmatpush1.bf16.msra.mxu1 %v2557_v47 }
 0x1f7   : > { %v918_v59 = vadd.f32 %v917_v57, %v3482_v7  ;;  %v919_v60 = vpop.f32.mrb[11].mxu1  ;;  %2538 = vmatprep.subr.bf16.mxu0 %v2801_v9  ;;  %2585 = vmatprep.subr.bf16.mxu1 %v2801_v9 }
 0x1f8   : > { %v920_v62 = vadd.f32 %v919_v60, %v3485_v8  ;;  %1305 = vmatprep.mubr.f32.mxu0 %v1087_v56  ;;  %v2560_v56 = vpack.c.bf16 %v1561_v50, %v1560_v49 }
 0x1f9   : > { %1306 = vmatmul.mubr.f32.gmra.mrb[72].mxu0 %v1086_v58  ;;  %v1088_v4 = vmax.f32 %v918_v59, 0.0  ;;  %v1562_v58 = vld [vmem:[#allocation2 + $0xc0] sm:$0xff]  ;;  %v1563_v59 = vld [vmem:[#allocation2 + $0xc8] sm:$0xff] }
 0x1fa   : > { %v1089_v2 = vmax.f32 %v920_v62, 0.0  ;;  %v923_v3 = vpop.f32.mrb[12].mxu1  ;;  %2540 = vmatpush1.bf16.msra.mxu0 %v2539_v52  ;;  %2601 = vmatpush1.bf16.msra.mxu1 %v2560_v56 }
 0x1fb   : > { %v924_v5 = vadd.f32 %v923_v3, %v3482_v7  ;;  %v925_v6 = vpop.f32.mrb[13].mxu1  ;;  %2541 = vmatprep.subr.bf16.mxu0 %v2801_v9  ;;  %2586 = vmatprep.subr.bf16.mxu1 %v2801_v9 }
 0x1fc   : > { %v926_v44 = vadd.f32 %v925_v6, %v3485_v8  ;;  %1311 = vmatprep.mubr.f32.mxu0 %v1089_v2  ;;  %v2563_v2 = vpack.c.bf16 %v1563_v59, %v1562_v58 }
 0x1fd   : > { %1312 = vmatmul.mubr.f32.gmra.mrb[74].mxu0 %v1088_v4  ;;  %v1090_v14 = vmax.f32 %v924_v5, 0.0  ;;  %v1564_v4 = vld [vmem:[#allocation2 + $0xd0] sm:$0xff]  ;;  %v1565_v5 = vld [vmem:[#allocation2 + $0xd8] sm:$0xff] }
 0x1fe   : > { %v1091_v12 = vmax.f32 %v926_v44, 0.0  ;;  %v929_v13 = vpop.f32.mrb[14].mxu1  ;;  %2543 = vmatpush1.bf16.msra.mxu0 %v2542_v61  ;;  %2602 = vmatpush1.bf16.msra.mxu1 %v2563_v2 }
 0x1ff   : > { %v930_v15 = vadd.f32 %v929_v13, %v3482_v7  ;;  %v931_v16 = vpop.f32.mrb[15].mxu1  ;;  %2544 = vmatprep.subr.bf16.mxu0 %v2801_v9  ;;  %2587 = vmatprep.subr.bf16.mxu1 %v2801_v9 }
 0x200   : > { %v932_v18 = vadd.f32 %v931_v16, %v3485_v8  ;;  %1317 = vmatprep.mubr.f32.mxu0 %v1091_v12  ;;  %v2566_v12 = vpack.c.bf16 %v1565_v5, %v1564_v4 }
 0x201   : > { %1318 = vmatmul.mubr.f32.gmra.mrb[76].mxu0 %v1090_v14  ;;  %v1092_v22 = vmax.f32 %v930_v15, 0.0 }
 0x202   : > { %v1093_v20 = vmax.f32 %v932_v18, 0.0  ;;  %v935_v21 = vpop.f32.mrb[16].mxu1  ;;  %2546 = vmatpush1.bf16.msra.mxu0 %v2545_v42  ;;  %2603 = vmatpush1.bf16.msra.mxu1 %v2566_v12 }
 0x203   : > { %v936_v23 = vadd.f32 %v935_v21, %v3482_v7  ;;  %v937_v24 = vpop.f32.mrb[17].mxu1  ;;  %2547 = vmatprep.subr.bf16.mxu0 %v2801_v9  ;;  %2588 = vmatprep.subr.bf16.mxu1 %v2801_v9 }
 0x204   : > { %v938_v26 = vadd.f32 %v937_v24, %v3485_v8  ;;  %1323 = vmatprep.mubr.f32.mxu0 %v1093_v20 }
 0x205   : > { %1324 = vmatmul.mubr.f32.gmra.mrb[78].mxu0 %v1092_v22  ;;  %v1094_v31 = vmax.f32 %v936_v23, 0.0 }
 0x206   : > { %v1095_v29 = vmax.f32 %v938_v26, 0.0  ;;  %v941_v30 = vpop.f32.mrb[18].mxu1  ;;  %2549 = vmatpush1.bf16.msra.mxu0 %v2548_v17 }
 0x207   : > { %v942_v32 = vadd.f32 %v941_v30, %v3482_v7  ;;  %v943_v33 = vpop.f32.mrb[19].mxu1  ;;  %2550 = vmatprep.subr.bf16.mxu0 %v2801_v9 }
 0x208   : > { %v944_v37 = vadd.f32 %v943_v33, %v3485_v8  ;;  %1329 = vmatprep.mubr.f32.mxu0 %v1095_v29 }
 0x209   : > { %1330 = vmatmul.mubr.f32.gmra.mrb[80].mxu0 %v1094_v31  ;;  %v1096_v43 = vmax.f32 %v942_v32, 0.0 }
 0x20a   : > { %v1097_v40 = vmax.f32 %v944_v37, 0.0  ;;  %v947_v41 = vpop.f32.mrb[20].mxu1  ;;  %2552 = vmatpush1.bf16.msra.mxu0 %v2551_v25 }
 0x20b   : > { %v948_v45 = vadd.f32 %v947_v41, %v3482_v7  ;;  %v949_v46 = vpop.f32.mrb[21].mxu1  ;;  %2553 = vmatprep.subr.bf16.mxu0 %v2801_v9 }
 0x20c   : > { %v950_v48 = vadd.f32 %v949_v46, %v3485_v8  ;;  %1335 = vmatprep.mubr.f32.mxu0 %v1097_v40 }
 0x20d   : > { %1336 = vmatmul.mubr.f32.gmra.mrb[82].mxu0 %v1096_v43  ;;  %v1098_v53 = vmax.f32 %v948_v45, 0.0 }
 0x20e   : > { %v1099_v51 = vmax.f32 %v950_v48, 0.0  ;;  %v953_v52 = vpop.f32.mrb[22].mxu1  ;;  %2555 = vmatpush1.bf16.msra.mxu0 %v2554_v35 }
 0x20f   : > { %v954_v54 = vadd.f32 %v953_v52, %v3482_v7  ;;  %v955_v55 = vpop.f32.mrb[23].mxu1  ;;  %2556 = vmatprep.subr.bf16.mxu0 %v2801_v9 }
 0x210   : > { %v956_v57 = vadd.f32 %v955_v55, %v3485_v8  ;;  %1341 = vmatprep.mubr.f32.mxu0 %v1099_v51 }
 0x211   : > { %1342 = vmatmul.mubr.f32.gmra.mrb[84].mxu0 %v1098_v53  ;;  %v1100_v62 = vmax.f32 %v954_v54, 0.0 }
 0x212   : > { %v1101_v60 = vmax.f32 %v956_v57, 0.0  ;;  %v959_v61 = vpop.f32.mrb[24].mxu1  ;;  %2558 = vmatpush1.bf16.msra.mxu0 %v2557_v47 }
 0x213   : > { %v960_v63 = vadd.f32 %v959_v61, %v3482_v7  ;;  %v961_v1 = vpop.f32.mrb[25].mxu1  ;;  %2559 = vmatprep.subr.bf16.mxu0 %v2801_v9 }
 0x214   : > { %v962_v3 = vadd.f32 %v961_v1, %v3485_v8  ;;  %1347 = vmatprep.mubr.f32.mxu0 %v1101_v60 }
 0x215   : > { %1348 = vmatmul.mubr.f32.gmra.mrb[86].mxu0 %v1100_v62  ;;  %v1102_v44 = vmax.f32 %v960_v63, 0.0 }
 0x216   : > { %v1103_v6 = vmax.f32 %v962_v3, 0.0  ;;  %v965_v42 = vpop.f32.mrb[26].mxu1  ;;  %2561 = vmatpush1.bf16.msra.mxu0 %v2560_v56  ;;  %v1567_v3 = vld [vmem:[#allocation2 + $0xe8] sm:$0xff] }
 0x217   : > { %v966_v10 = vadd.f32 %v965_v42, %v3482_v7  ;;  %v967_v11 = vpop.f32.mrb[27].mxu1  ;;  %2562 = vmatprep.subr.bf16.mxu0 %v2801_v9 }
 0x218   : > { %v968_v13 = vadd.f32 %v967_v11, %v3485_v8  ;;  %1353 = vmatprep.mubr.f32.mxu0 %v1103_v6 }
 0x219   : > { %1354 = vmatmul.mubr.f32.gmra.mrb[88].mxu0 %v1102_v44  ;;  %v1104_v16 = vmax.f32 %v966_v10, 0.0 }
 0x21a   : > { %v1105_v14 = vmax.f32 %v968_v13, 0.0  ;;  %v971_v15 = vpop.f32.mrb[28].mxu1  ;;  %2564 = vmatpush1.bf16.msra.mxu0 %v2563_v2  ;;  %v1566_v2 = vld [vmem:[#allocation2 + $0xe0] sm:$0xff]  ;;  %v1569_v13 = vld [vmem:[#allocation2 + $0xf8] sm:$0xff] }
 0x21b   : > { %v972_v17 = vadd.f32 %v971_v15, %v3482_v7  ;;  %v973_v18 = vpop.f32.mrb[29].mxu1  ;;  %2565 = vmatprep.subr.bf16.mxu0 %v2801_v9  ;;  %v2569_v6 = vpack.c.bf16 %v1567_v3, %v1566_v2 }
 0x21c   : > { %v974_v0 = vadd.f32 %v973_v18, %v3485_v8  ;;  %1359 = vmatprep.mubr.f32.mxu0 %v1105_v14 }
 0x21d   : > { %1360 = vmatmul.mubr.f32.gmra.mrb[90].mxu0 %v1104_v16  ;;  %v1106_v21 = vmax.f32 %v972_v17, 0.0  ;;  %2604 = vmatpush1.bf16.msra.mxu1 %v2569_v6 }
 0x21e   : > { %v1107_v19 = vmax.f32 %v974_v0, 0.0  ;;  %v977_v20 = vpop.f32.mrb[30].mxu1  ;;  %2567 = vmatpush1.bf16.msra.mxu0 %v2566_v12  ;;  %v1568_v12 = vld [vmem:[#allocation2 + $0xf0] sm:$0xff]  ;;  %2589 = vmatprep.subr.bf16.mxu1 %v2801_v9 }
 0x21f   : > { %v978_v22 = vadd.f32 %v977_v20, %v3482_v7  ;;  %v979_v23 = vpop.f32.mrb[31].mxu1  ;;  %2568 = vmatprep.subr.bf16.mxu0 %v2801_v9  ;;  %v2572_v16 = vpack.c.bf16 %v1569_v13, %v1568_v12 }
 0x220   : > { %v980_v24 = vadd.f32 %v979_v23, %v3485_v8  ;;  %1365 = vmatprep.mubr.f32.mxu0 %v1107_v19 }
 0x221   : > { %1366 = vmatmul.mubr.f32.gmra.mrb[92].mxu0 %v1106_v21  ;;  %v1108_v27 = vmax.f32 %v978_v22, 0.0  ;;  %2605 = vmatpush1.bf16.msra.mxu1 %v2572_v16 }
 0x222   : > { %v1109_v25 = vmax.f32 %v980_v24, 0.0  ;;  %v983_v26 = vpop.f32.mrb[32].mxu1  ;;  %2570 = vmatpush1.bf16.msra.mxu0 %v2569_v6 }
 0x223   : > { %v984_v28 = vadd.f32 %v983_v26, %v3482_v7  ;;  %v985_v29 = vpop.f32.mrb[33].mxu1  ;;  %2571 = vmatprep.subr.bf16.mxu0 %v2801_v9 }
 0x224   : > { %v986_v30 = vadd.f32 %v985_v29, %v3485_v8  ;;  %1371 = vmatprep.mubr.f32.mxu0 %v1109_v25 }
 0x225   : > { %1372 = vmatmul.mubr.f32.gmra.mrb[94].mxu0 %v1108_v27  ;;  %v1110_v33 = vmax.f32 %v984_v28, 0.0 }
 0x226   : > { %v1111_v31 = vmax.f32 %v986_v30, 0.0  ;;  %v989_v32 = vpop.f32.mrb[34].mxu1  ;;  %2573 = vmatpush1.bf16.msra.mxu0 %v2572_v16 }
 0x227   : > { %v990_v35 = vadd.f32 %v989_v32, %v3482_v7  ;;  %v991_v37 = vpop.f32.mrb[35].mxu1 }
 0x228   : > { %v992_v38 = vadd.f32 %v991_v37, %v3485_v8  ;;  %1377 = vmatprep.mubr.f32.mxu0 %v1111_v31 }
 0x229   : > { %1378 = vmatmul.mubr.f32.gmra.mrb[96].mxu0 %v1110_v33  ;;  %v1112_v41 = vmax.f32 %v990_v35, 0.0 }
 0x22a   : > { %v1113_v39 = vmax.f32 %v992_v38, 0.0  ;;  %v995_v40 = vpop.f32.mrb[36].mxu1 }
 0x22b   : > { %v996_v43 = vadd.f32 %v995_v40, %v3482_v7  ;;  %v997_v45 = vpop.f32.mrb[37].mxu1 }
 0x22c   : > { %v998_v46 = vadd.f32 %v997_v45, %v3485_v8  ;;  %1383 = vmatprep.mubr.f32.mxu0 %v1113_v39 }
 0x22d   : > { %1384 = vmatmul.mubr.f32.gmra.mrb[98].mxu0 %v1112_v41  ;;  %v1114_v49 = vmax.f32 %v996_v43, 0.0 }
 0x22e   : > { %v1115_v47 = vmax.f32 %v998_v46, 0.0  ;;  %v1001_v48 = vpop.f32.mrb[38].mxu1 }
 0x22f   : > { %v1002_v50 = vadd.f32 %v1001_v48, %v3482_v7  ;;  %v1003_v51 = vpop.f32.mrb[39].mxu1 }
 0x230   : > { %v1004_v52 = vadd.f32 %v1003_v51, %v3485_v8  ;;  %1389 = vmatprep.mubr.f32.mxu0 %v1115_v47 }
 0x231   : > { %1390 = vmatmul.mubr.f32.gmra.mrb[100].mxu0 %v1114_v49  ;;  %v1116_v55 = vmax.f32 %v1002_v50, 0.0 }
 0x232   : > { %v1117_v53 = vmax.f32 %v1004_v52, 0.0  ;;  %v1007_v54 = vpop.f32.mrb[40].mxu1 }
 0x233   : > { %v1008_v56 = vadd.f32 %v1007_v54, %v3482_v7  ;;  %v1009_v57 = vpop.f32.mrb[41].mxu1 }
 0x234   : > { %v1010_v58 = vadd.f32 %v1009_v57, %v3485_v8  ;;  %1395 = vmatprep.mubr.f32.mxu0 %v1117_v53 }
 0x235   : > { %1396 = vmatmul.mubr.f32.gmra.mrb[102].mxu0 %v1116_v55  ;;  %v1118_v61 = vmax.f32 %v1008_v56, 0.0 }
 0x236   : > { %v1119_v59 = vmax.f32 %v1010_v58, 0.0  ;;  %v1013_v60 = vpop.f32.mrb[42].mxu1 }
 0x237   : > { %v1014_v62 = vadd.f32 %v1013_v60, %v3482_v7  ;;  %v1015_v63 = vpop.f32.mrb[43].mxu1 }
 0x238   : > { %v1016_v1 = vadd.f32 %v1015_v63, %v3485_v8  ;;  %1401 = vmatprep.mubr.f32.mxu0 %v1119_v59 }
 0x239   : > { %1402 = vmatmul.mubr.f32.gmra.mrb[104].mxu0 %v1118_v61  ;;  %v1120_v42 = vmax.f32 %v1014_v62, 0.0 }
 0x23a   : > { %v1121_v4 = vmax.f32 %v1016_v1, 0.0  ;;  %v1019_v5 = vpop.f32.mrb[44].mxu1 }
 0x23b   : > { %v1020_v44 = vadd.f32 %v1019_v5, %v3482_v7  ;;  %v1021_v10 = vpop.f32.mrb[45].mxu1 }
 0x23c   : > { %v1022_v11 = vadd.f32 %v1021_v10, %v3485_v8  ;;  %1407 = vmatprep.mubr.f32.mxu0 %v1121_v4 }
 0x23d   : > { %1408 = vmatmul.mubr.f32.gmra.mrb[106].mxu0 %v1120_v42  ;;  %v1122_v17 = vmax.f32 %v1020_v44, 0.0 }
 0x23e   : > { %v1123_v14 = vmax.f32 %v1022_v11, 0.0  ;;  %v1025_v15 = vpop.f32.mrb[46].mxu1  ;;  %v2355_v11 = vld [vmem:[%s4033_s5 + $0x2] ss:$8 sm:$0x3] }
 0x23f   : > { %v1026_v18 = vadd.f32 %v1025_v15, %v3482_v7  ;;  %v1027_v0 = vpop.f32.mrb[47].mxu1  ;;  %v3587_v12 = vrot.slane %v2355_v11, %v3245_v34  ;;  %v3590_v13 = vrot.slane %v2355_v11, %v3250_v36 }
 0x240   : > { %v1028_v19 = vadd.f32 %v1027_v0, %v3485_v8  ;;  %1413 = vmatprep.mubr.f32.mxu0 %v1123_v14 }
 0x241   : > { %1414 = vmatmul.mubr.f32.gmra.mrb[108].mxu0 %v1122_v17  ;;  %v1124_v22 = vmax.f32 %v1026_v18, 0.0 }
 0x242   : > { %v1125_v20 = vmax.f32 %v1028_v19, 0.0  ;;  %v1031_v21 = vpop.f32.mrb[48].mxu1 }
 0x243   : > { %v1032_v23 = vadd.f32 %v1031_v21, %v3482_v7  ;;  %v1033_v24 = vpop.f32.mrb[49].mxu1 }
 0x244   : > { %v1034_v25 = vadd.f32 %v1033_v24, %v3485_v8  ;;  %1419 = vmatprep.mubr.f32.mxu0 %v1125_v20 }
 0x245   : > { %1420 = vmatmul.mubr.f32.gmra.mrb[110].mxu0 %v1124_v22  ;;  %v1126_v28 = vmax.f32 %v1032_v23, 0.0 }
 0x246   : > { %v1127_v26 = vmax.f32 %v1034_v25, 0.0  ;;  %v1037_v27 = vpop.f32.mrb[50].mxu1 }
 0x247   : > { %v1038_v9 = vadd.f32 %v1037_v27, %v3482_v7  ;;  %v1039_v29 = vpop.f32.mrb[51].mxu1 }
 0x248   : > { %v1040_v30 = vadd.f32 %v1039_v29, %v3485_v8  ;;  %1425 = vmatprep.mubr.f32.mxu0 %v1127_v26 }
 0x249   : > { %1426 = vmatmul.mubr.f32.gmra.mrb[112].mxu0 %v1126_v28  ;;  %v1128_v33 = vmax.f32 %v1038_v9, 0.0 }
 0x24a   : > { %v1129_v31 = vmax.f32 %v1040_v30, 0.0  ;;  %v1043_v32 = vpop.f32.mrb[52].mxu1 }
 0x24b   : > { %v1044_v35 = vadd.f32 %v1043_v32, %v3482_v7  ;;  %v1045_v37 = vpop.f32.mrb[53].mxu1 }
 0x24c   : > { %v1046_v38 = vadd.f32 %v1045_v37, %v3485_v8  ;;  %1431 = vmatprep.mubr.f32.mxu0 %v1129_v31 }
 0x24d   : > { %1432 = vmatmul.mubr.f32.gmra.mrb[114].mxu0 %v1128_v33  ;;  %v1130_v41 = vmax.f32 %v1044_v35, 0.0 }
 0x24e   : > { %v1131_v39 = vmax.f32 %v1046_v38, 0.0  ;;  %v1049_v40 = vpop.f32.mrb[54].mxu1 }
 0x24f   : > { %v1050_v43 = vadd.f32 %v1049_v40, %v3482_v7  ;;  %v1051_v45 = vpop.f32.mrb[55].mxu1 }
 0x250   : > { %v1052_v46 = vadd.f32 %v1051_v45, %v3485_v8  ;;  %1437 = vmatprep.mubr.f32.mxu0 %v1131_v39 }
 0x251   : > { %1438 = vmatmul.mubr.f32.gmra.mrb[116].mxu0 %v1130_v41  ;;  %v1132_v49 = vmax.f32 %v1050_v43, 0.0 }
 0x252   : > { %v1133_v47 = vmax.f32 %v1052_v46, 0.0  ;;  %v1055_v48 = vpop.f32.mrb[56].mxu1 }
 0x253   : > { %v1056_v50 = vadd.f32 %v1055_v48, %v3482_v7  ;;  %v1057_v51 = vpop.f32.mrb[57].mxu1 }
 0x254   : > { %v1058_v52 = vadd.f32 %v1057_v51, %v3485_v8  ;;  %1443 = vmatprep.mubr.f32.mxu0 %v1133_v47 }
 0x255   : > { %1444 = vmatmul.mubr.f32.gmra.mrb[118].mxu0 %v1132_v49  ;;  %v1134_v55 = vmax.f32 %v1056_v50, 0.0 }
 0x256   : > { %v1135_v53 = vmax.f32 %v1058_v52, 0.0  ;;  %v1061_v54 = vpop.f32.mrb[58].mxu1 }
 0x257   : > { %v1062_v56 = vadd.f32 %v1061_v54, %v3482_v7  ;;  %v1063_v57 = vpop.f32.mrb[59].mxu1 }
 0x258   : > { %v1064_v58 = vadd.f32 %v1063_v57, %v3485_v8  ;;  %1449 = vmatprep.mubr.f32.mxu0 %v1135_v53 }
 0x259   : > { %1450 = vmatmul.mubr.f32.gmra.mrb[120].mxu0 %v1134_v55  ;;  %v1136_v61 = vmax.f32 %v1062_v56, 0.0 }
 0x25a   : > { %v1137_v59 = vmax.f32 %v1064_v58, 0.0  ;;  %v1067_v60 = vpop.f32.mrb[60].mxu1 }
 0x25b   : > { %v1068_v62 = vadd.f32 %v1067_v60, %v3482_v7  ;;  %v1069_v63 = vpop.f32.mrb[61].mxu1 }
 0x25c   : > { %v1070_v1 = vadd.f32 %v1069_v63, %v3485_v8  ;;  %1455 = vmatprep.mubr.f32.mxu0 %v1137_v59 }
 0x25d   : > { %1456 = vmatmul.mubr.f32.gmra.mrb[122].mxu0 %v1136_v61  ;;  %v1138_v4 = vmax.f32 %v1068_v62, 0.0 }
 0x25e   : > { %v1139_v2 = vmax.f32 %v1070_v1, 0.0  ;;  %v1073_v3 = vpop.f32.mrb[62].mxu1 }
 0x25f   : > { %v1074_v5 = vadd.f32 %v1073_v3, %v3482_v7  ;;  %v1075_v6 = vpop.f32.mrb[63].mxu1 }
 0x260   : > { %v1076_v42 = vadd.f32 %v1075_v6, %v3485_v8  ;;  %1461 = vmatprep.mubr.f32.mxu0 %v1139_v2 }
 0x261   : > { %1462 = vmatmul.mubr.f32.gmra.mrb[124].mxu0 %v1138_v4  ;;  %v1140_v10 = vmax.f32 %v1074_v5, 0.0 }
 0x262   : > { %v1141_v44 = vmax.f32 %v1076_v42, 0.0 }
 0x264   : > { %1467 = vmatprep.mubr.f32.mxu0 %v1141_v44 }
 0x265   : > { %1468 = vmatmul.mubr.f32.gmra.mrb[126].mxu0 %v1140_v10 }
 0x2bc   : > { %v1283_v7 = vpop.f32.mrb[64].mxu0 }
 0x2bd   : > { %v1284_v14 = vadd.f32 %v1283_v7, %v3587_v12  ;;  %v1285_v8 = vpop.f32.mrb[65].mxu0 }
 0x2be   : > { %v1286_v15 = vadd.f32 %v1285_v8, %v3590_v13 }
 0x2bf   : > { %v1474_v18 = vmax.f32 %v1284_v14, 0.0 }
 0x2c0   : > { %v1475_v16 = vmax.f32 %v1286_v15, 0.0  ;;  %v1289_v17 = vpop.f32.mrb[66].mxu0 }
 0x2c1   : > { %v1290_v0 = vadd.f32 %v1289_v17, %v3587_v12  ;;  %v1291_v19 = vpop.f32.mrb[67].mxu0 }
 0x2c2   : > { %v1292_v20 = vadd.f32 %v1291_v19, %v3590_v13  ;;  %1634 = vmatprep.mubr.f32.mxu0 %v1475_v16 }
 0x2c3   : > { %1635 = vmatmul.mubr.f32.vlgmr.msra.gmra.mrb[128].mxu0 %v1474_v18  ;;  %v1476_v36 = vmax.f32 %v1290_v0, 0.0 }
 0x2c4   : > { %v1477_v34 = vmax.f32 %v1292_v20, 0.0  ;;  %v1295_v21 = vpop.f32.mrb[68].mxu0 }
 0x2c5   : > { %v1296_v22 = vadd.f32 %v1295_v21, %v3587_v12  ;;  %v1297_v23 = vpop.f32.mrb[69].mxu0 }
 0x2c6   : > { %v1298_v24 = vadd.f32 %v1297_v23, %v3590_v13  ;;  %1639 = vmatprep.mubr.f32.mxu0 %v1477_v34 }
 0x2c7   : > { %1640 = vmatmul.mubr.f32.gmra.mrb[130].mxu0 %v1476_v36  ;;  %v1478_v27 = vmax.f32 %v1296_v22, 0.0 }
 0x2c8   : > { %v1479_v25 = vmax.f32 %v1298_v24, 0.0  ;;  %v1301_v26 = vpop.f32.mrb[70].mxu0 }
 0x2c9   : > { %v1302_v28 = vadd.f32 %v1301_v26, %v3587_v12  ;;  %v1303_v9 = vpop.f32.mrb[71].mxu0 }
 0x2ca   : > { %v1304_v29 = vadd.f32 %v1303_v9, %v3590_v13  ;;  %1644 = vmatprep.mubr.f32.mxu0 %v1479_v25 }
 0x2cb   : > { %1645 = vmatmul.mubr.f32.gmra.mrb[132].mxu0 %v1478_v27  ;;  %v1480_v32 = vmax.f32 %v1302_v28, 0.0 }
 0x2cc   : > { %v1481_v30 = vmax.f32 %v1304_v29, 0.0  ;;  %v1307_v31 = vpop.f32.mrb[72].mxu0 }
 0x2cd   : > { %v1308_v33 = vadd.f32 %v1307_v31, %v3587_v12  ;;  %v1309_v35 = vpop.f32.mrb[73].mxu0 }
 0x2ce   : > { %v1310_v37 = vadd.f32 %v1309_v35, %v3590_v13  ;;  %1649 = vmatprep.mubr.f32.mxu0 %v1481_v30 }
 0x2cf   : > { %1650 = vmatmul.mubr.f32.gmra.mrb[134].mxu0 %v1480_v32  ;;  %v1482_v40 = vmax.f32 %v1308_v33, 0.0 }
 0x2d0   : > { %v1483_v38 = vmax.f32 %v1310_v37, 0.0  ;;  %v1313_v39 = vpop.f32.mrb[74].mxu0 }
 0x2d1   : > { %v1314_v41 = vadd.f32 %v1313_v39, %v3587_v12  ;;  %v1315_v43 = vpop.f32.mrb[75].mxu0 }
 0x2d2   : > { %v1316_v45 = vadd.f32 %v1315_v43, %v3590_v13  ;;  %1654 = vmatprep.mubr.f32.mxu0 %v1483_v38 }
 0x2d3   : > { %1655 = vmatmul.mubr.f32.gmra.mrb[136].mxu0 %v1482_v40  ;;  %v1484_v48 = vmax.f32 %v1314_v41, 0.0 }
 0x2d4   : > { %v1485_v46 = vmax.f32 %v1316_v45, 0.0  ;;  %v1319_v47 = vpop.f32.mrb[76].mxu0 }
 0x2d5   : > { %v1320_v49 = vadd.f32 %v1319_v47, %v3587_v12  ;;  %v1321_v50 = vpop.f32.mrb[77].mxu0 }
 0x2d6   : > { %v1322_v51 = vadd.f32 %v1321_v50, %v3590_v13  ;;  %1659 = vmatprep.mubr.f32.mxu0 %v1485_v46 }
 0x2d7   : > { %1660 = vmatmul.mubr.f32.gmra.mrb[138].mxu0 %v1484_v48  ;;  %v1486_v54 = vmax.f32 %v1320_v49, 0.0 }
 0x2d8   : > { %v1487_v52 = vmax.f32 %v1322_v51, 0.0  ;;  %v1325_v53 = vpop.f32.mrb[78].mxu0 }
 0x2d9   : > { %v1326_v55 = vadd.f32 %v1325_v53, %v3587_v12  ;;  %v1327_v56 = vpop.f32.mrb[79].mxu0 }
 0x2da   : > { %v1328_v57 = vadd.f32 %v1327_v56, %v3590_v13  ;;  %1664 = vmatprep.mubr.f32.mxu0 %v1487_v52 }
 0x2db   : > { %1665 = vmatmul.mubr.f32.gmra.mrb[140].mxu0 %v1486_v54  ;;  %v1488_v60 = vmax.f32 %v1326_v55, 0.0 }
 0x2dc   : > { %v1489_v58 = vmax.f32 %v1328_v57, 0.0  ;;  %v1331_v59 = vpop.f32.mrb[80].mxu0 }
 0x2dd   : > { %v1332_v61 = vadd.f32 %v1331_v59, %v3587_v12  ;;  %v1333_v62 = vpop.f32.mrb[81].mxu0 }
 0x2de   : > { %v1334_v63 = vadd.f32 %v1333_v62, %v3590_v13  ;;  %1669 = vmatprep.mubr.f32.mxu1 %v1489_v58 }
 0x2df   : > { %1670 = vmatmul.mubr.f32.vlgmr.msra.gmra.mrb[64].mxu1 %v1488_v60  ;;  %v1490_v3 = vmax.f32 %v1332_v61, 0.0 }
 0x2e0   : > { %v1491_v1 = vmax.f32 %v1334_v63, 0.0  ;;  %v1337_v2 = vpop.f32.mrb[82].mxu0 }
 0x2e1   : > { %v1338_v4 = vadd.f32 %v1337_v2, %v3587_v12  ;;  %v1339_v5 = vpop.f32.mrb[83].mxu0 }
 0x2e2   : > { %v1340_v6 = vadd.f32 %v1339_v5, %v3590_v13  ;;  %1674 = vmatprep.mubr.f32.mxu1 %v1491_v1 }
 0x2e3   : > { %1675 = vmatmul.mubr.f32.gmra.mrb[66].mxu1 %v1490_v3  ;;  %v1492_v10 = vmax.f32 %v1338_v4, 0.0 }
 0x2e4   : > { %v1493_v42 = vmax.f32 %v1340_v6, 0.0  ;;  %v1343_v44 = vpop.f32.mrb[84].mxu0 }
 0x2e5   : > { %v1344_v11 = vadd.f32 %v1343_v44, %v3587_v12  ;;  %v1345_v7 = vpop.f32.mrb[85].mxu0 }
 0x2e6   : > { %v1346_v14 = vadd.f32 %v1345_v7, %v3590_v13  ;;  %1679 = vmatprep.mubr.f32.mxu1 %v1493_v42 }
 0x2e7   : > { %1680 = vmatmul.mubr.f32.gmra.mrb[68].mxu1 %v1492_v10  ;;  %v1494_v16 = vmax.f32 %v1344_v11, 0.0 }
 0x2e8   : > { %v1495_v8 = vmax.f32 %v1346_v14, 0.0  ;;  %v1349_v15 = vpop.f32.mrb[86].mxu0 }
 0x2e9   : > { %v1350_v17 = vadd.f32 %v1349_v15, %v3587_v12  ;;  %v1351_v18 = vpop.f32.mrb[87].mxu0 }
 0x2ea   : > { %v1352_v0 = vadd.f32 %v1351_v18, %v3590_v13  ;;  %1684 = vmatprep.mubr.f32.mxu1 %v1495_v8 }
 0x2eb   : > { %1685 = vmatmul.mubr.f32.gmra.mrb[70].mxu1 %v1494_v16  ;;  %v1496_v34 = vmax.f32 %v1350_v17, 0.0 }
 0x2ec   : > { %v1497_v19 = vmax.f32 %v1352_v0, 0.0  ;;  %v1355_v20 = vpop.f32.mrb[88].mxu0 }
 0x2ed   : > { %v1356_v21 = vadd.f32 %v1355_v20, %v3587_v12  ;;  %v1357_v36 = vpop.f32.mrb[89].mxu0 }
 0x2ee   : > { %v1358_v22 = vadd.f32 %v1357_v36, %v3590_v13  ;;  %1689 = vmatprep.mubr.f32.mxu1 %v1497_v19 }
 0x2ef   : > { %1690 = vmatmul.mubr.f32.gmra.mrb[72].mxu1 %v1496_v34  ;;  %v1498_v25 = vmax.f32 %v1356_v21, 0.0 }
 0x2f0   : > { %v1499_v23 = vmax.f32 %v1358_v22, 0.0  ;;  %v1361_v24 = vpop.f32.mrb[90].mxu0 }
 0x2f1   : > { %v1362_v26 = vadd.f32 %v1361_v24, %v3587_v12  ;;  %v1363_v27 = vpop.f32.mrb[91].mxu0 }
 0x2f2   : > { %v1364_v28 = vadd.f32 %v1363_v27, %v3590_v13  ;;  %1694 = vmatprep.mubr.f32.mxu1 %v1499_v23 }
 0x2f3   : > { %1695 = vmatmul.mubr.f32.gmra.mrb[74].mxu1 %v1498_v25  ;;  %v1500_v30 = vmax.f32 %v1362_v26, 0.0 }
 0x2f4   : > { %v1501_v9 = vmax.f32 %v1364_v28, 0.0  ;;  %v1367_v29 = vpop.f32.mrb[92].mxu0 }
 0x2f5   : > { %v1368_v31 = vadd.f32 %v1367_v29, %v3587_v12  ;;  %v1369_v32 = vpop.f32.mrb[93].mxu0 }
 0x2f6   : > { %v1370_v33 = vadd.f32 %v1369_v32, %v3590_v13  ;;  %1699 = vmatprep.mubr.f32.mxu1 %v1501_v9 }
 0x2f7   : > { %1700 = vmatmul.mubr.f32.gmra.mrb[76].mxu1 %v1500_v30  ;;  %v1502_v38 = vmax.f32 %v1368_v31, 0.0 }
 0x2f8   : > { %v1503_v35 = vmax.f32 %v1370_v33, 0.0  ;;  %v1373_v37 = vpop.f32.mrb[94].mxu0 }
 0x2f9   : > { %v1374_v39 = vadd.f32 %v1373_v37, %v3587_v12  ;;  %v1375_v40 = vpop.f32.mrb[95].mxu0 }
 0x2fa   : > { %v1376_v41 = vadd.f32 %v1375_v40, %v3590_v13  ;;  %1704 = vmatprep.mubr.f32.mxu1 %v1503_v35 }
 0x2fb   : > { %1705 = vmatmul.mubr.f32.gmra.mrb[78].mxu1 %v1502_v38  ;;  %v1504_v46 = vmax.f32 %v1374_v39, 0.0 }
 0x2fc   : > { %v1505_v43 = vmax.f32 %v1376_v41, 0.0  ;;  %v1379_v45 = vpop.f32.mrb[96].mxu0 }
 0x2fd   : > { %v1380_v47 = vadd.f32 %v1379_v45, %v3587_v12  ;;  %v1381_v48 = vpop.f32.mrb[97].mxu0 }
 0x2fe   : > { %v1382_v49 = vadd.f32 %v1381_v48, %v3590_v13  ;;  %1709 = vmatprep.mubr.f32.mxu1 %v1505_v43 }
 0x2ff   : > { %1710 = vmatmul.mubr.f32.gmra.mrb[80].mxu1 %v1504_v46  ;;  %v1506_v52 = vmax.f32 %v1380_v47, 0.0 }
 0x300   : > { %v1507_v50 = vmax.f32 %v1382_v49, 0.0  ;;  %v1385_v51 = vpop.f32.mrb[98].mxu0 }
 0x301   : > { %v1386_v53 = vadd.f32 %v1385_v51, %v3587_v12  ;;  %v1387_v54 = vpop.f32.mrb[99].mxu0 }
 0x302   : > { %v1388_v55 = vadd.f32 %v1387_v54, %v3590_v13  ;;  %1714 = vmatprep.mubr.f32.mxu1 %v1507_v50 }
 0x303   : > { %1715 = vmatmul.mubr.f32.gmra.mrb[82].mxu1 %v1506_v52  ;;  %v1508_v58 = vmax.f32 %v1386_v53, 0.0 }
 0x304   : > { %v1509_v56 = vmax.f32 %v1388_v55, 0.0  ;;  %v1391_v57 = vpop.f32.mrb[100].mxu0 }
 0x305   : > { %v1392_v59 = vadd.f32 %v1391_v57, %v3587_v12  ;;  %v1393_v60 = vpop.f32.mrb[101].mxu0 }
 0x306   : > { %v1394_v61 = vadd.f32 %v1393_v60, %v3590_v13  ;;  %1719 = vmatprep.mubr.f32.mxu1 %v1509_v56 }
 0x307   : > { %1720 = vmatmul.mubr.f32.gmra.mrb[84].mxu1 %v1508_v58  ;;  %v1510_v1 = vmax.f32 %v1392_v59, 0.0 }
 0x308   : > { %v1511_v62 = vmax.f32 %v1394_v61, 0.0  ;;  %v1397_v63 = vpop.f32.mrb[102].mxu0 }
 0x309   : > { %v1398_v2 = vadd.f32 %v1397_v63, %v3587_v12  ;;  %v1399_v3 = vpop.f32.mrb[103].mxu0 }
 0x30a   : > { %v1400_v4 = vadd.f32 %v1399_v3, %v3590_v13  ;;  %1724 = vmatprep.mubr.f32.mxu1 %v1511_v62 }
 0x30b   : > { %1725 = vmatmul.mubr.f32.gmra.mrb[86].mxu1 %v1510_v1  ;;  %v1512_v42 = vmax.f32 %v1398_v2, 0.0 }
 0x30c   : > { %v1513_v5 = vmax.f32 %v1400_v4, 0.0  ;;  %v1403_v6 = vpop.f32.mrb[104].mxu0 }
 0x30d   : > { %v1404_v44 = vadd.f32 %v1403_v6, %v3587_v12  ;;  %v1405_v10 = vpop.f32.mrb[105].mxu0 }
 0x30e   : > { %v1406_v11 = vadd.f32 %v1405_v10, %v3590_v13  ;;  %1729 = vmatprep.mubr.f32.mxu1 %v1513_v5 }
 0x30f   : > { %1730 = vmatmul.mubr.f32.gmra.mrb[88].mxu1 %v1512_v42  ;;  %v1514_v8 = vmax.f32 %v1404_v44, 0.0 }
 0x310   : > { %v1515_v7 = vmax.f32 %v1406_v11, 0.0  ;;  %v1409_v14 = vpop.f32.mrb[106].mxu0 }
 0x311   : > { %v1410_v15 = vadd.f32 %v1409_v14, %v3587_v12  ;;  %v1411_v16 = vpop.f32.mrb[107].mxu0 }
 0x312   : > { %v1412_v17 = vadd.f32 %v1411_v16, %v3590_v13  ;;  %1734 = vmatprep.mubr.f32.mxu1 %v1515_v7 }
 0x313   : > { %1735 = vmatmul.mubr.f32.gmra.mrb[90].mxu1 %v1514_v8  ;;  %v1516_v19 = vmax.f32 %v1410_v15, 0.0 }
 0x314   : > { %v1517_v18 = vmax.f32 %v1412_v17, 0.0  ;;  %v1415_v0 = vpop.f32.mrb[108].mxu0 }
 0x315   : > { %v1416_v20 = vadd.f32 %v1415_v0, %v3587_v12  ;;  %v1417_v34 = vpop.f32.mrb[109].mxu0 }
 0x316   : > { %v1418_v21 = vadd.f32 %v1417_v34, %v3590_v13  ;;  %1739 = vmatprep.mubr.f32.mxu1 %v1517_v18  ;;  %v3659_v18 = vld [vmem:[%s4033_s5 + $0x3] ss:$0 sm:$0xff] }
 0x317   : > { %1740 = vmatmul.mubr.f32.gmra.mrb[92].mxu1 %v1516_v19  ;;  %v1518_v23 = vmax.f32 %v1416_v20, 0.0 }
 0x318   : > { %v1519_v36 = vmax.f32 %v1418_v21, 0.0  ;;  %v1421_v22 = vpop.f32.mrb[110].mxu0 }
 0x319   : > { %v1422_v24 = vadd.f32 %v1421_v22, %v3587_v12  ;;  %v1423_v25 = vpop.f32.mrb[111].mxu0 }
 0x31a   : > { %v1424_v26 = vadd.f32 %v1423_v25, %v3590_v13  ;;  %1744 = vmatprep.mubr.f32.mxu1 %v1519_v36 }
 0x31b   : > { %1745 = vmatmul.mubr.f32.gmra.mrb[94].mxu1 %v1518_v23  ;;  %v1520_v9 = vmax.f32 %v1422_v24, 0.0 }
 0x31c   : > { %v1521_v27 = vmax.f32 %v1424_v26, 0.0  ;;  %v1427_v28 = vpop.f32.mrb[112].mxu0 }
 0x31d   : > { %v1428_v29 = vadd.f32 %v1427_v28, %v3587_v12  ;;  %v1429_v30 = vpop.f32.mrb[113].mxu0 }
 0x31e   : > { %v1430_v31 = vadd.f32 %v1429_v30, %v3590_v13  ;;  %1749 = vmatprep.mubr.f32.mxu1 %v1521_v27 }
 0x31f   : > { %1750 = vmatmul.mubr.f32.gmra.mrb[96].mxu1 %v1520_v9  ;;  %v1522_v35 = vmax.f32 %v1428_v29, 0.0 }
 0x320   : > { %v1523_v32 = vmax.f32 %v1430_v31, 0.0  ;;  %v1433_v33 = vpop.f32.mrb[114].mxu0 }
 0x321   : > { %v1434_v37 = vadd.f32 %v1433_v33, %v3587_v12  ;;  %v1435_v38 = vpop.f32.mrb[115].mxu0 }
 0x322   : > { %v1436_v39 = vadd.f32 %v1435_v38, %v3590_v13  ;;  %1754 = vmatprep.mubr.f32.mxu1 %v1523_v32 }
 0x323   : > { %1755 = vmatmul.mubr.f32.gmra.mrb[98].mxu1 %v1522_v35  ;;  %v1524_v43 = vmax.f32 %v1434_v37, 0.0 }
 0x324   : > { %v1525_v40 = vmax.f32 %v1436_v39, 0.0  ;;  %v1439_v41 = vpop.f32.mrb[116].mxu0 }
 0x325   : > { %v1440_v45 = vadd.f32 %v1439_v41, %v3587_v12  ;;  %v1441_v46 = vpop.f32.mrb[117].mxu0 }
 0x326   : > { %v1442_v47 = vadd.f32 %v1441_v46, %v3590_v13  ;;  %1759 = vmatprep.mubr.f32.mxu1 %v1525_v40 }
 0x327   : > { %1760 = vmatmul.mubr.f32.gmra.mrb[100].mxu1 %v1524_v43  ;;  %v1526_v50 = vmax.f32 %v1440_v45, 0.0 }
 0x328   : > { %v1527_v48 = vmax.f32 %v1442_v47, 0.0  ;;  %v1445_v49 = vpop.f32.mrb[118].mxu0 }
 0x329   : > { %v1446_v51 = vadd.f32 %v1445_v49, %v3587_v12  ;;  %v1447_v52 = vpop.f32.mrb[119].mxu0 }
 0x32a   : > { %v1448_v53 = vadd.f32 %v1447_v52, %v3590_v13  ;;  %1764 = vmatprep.mubr.f32.mxu1 %v1527_v48 }
 0x32b   : > { %1765 = vmatmul.mubr.f32.gmra.mrb[102].mxu1 %v1526_v50  ;;  %v1528_v56 = vmax.f32 %v1446_v51, 0.0 }
 0x32c   : > { %v1529_v54 = vmax.f32 %v1448_v53, 0.0  ;;  %v1451_v55 = vpop.f32.mrb[120].mxu0 }
 0x32d   : > { %v1452_v57 = vadd.f32 %v1451_v55, %v3587_v12  ;;  %v1453_v58 = vpop.f32.mrb[121].mxu0 }
 0x32e   : > { %v1454_v59 = vadd.f32 %v1453_v58, %v3590_v13  ;;  %1769 = vmatprep.mubr.f32.mxu1 %v1529_v54 }
 0x32f   : > { %1770 = vmatmul.mubr.f32.gmra.mrb[104].mxu1 %v1528_v56  ;;  %v1530_v62 = vmax.f32 %v1452_v57, 0.0 }
 0x330   : > { %v1531_v60 = vmax.f32 %v1454_v59, 0.0  ;;  %v1457_v61 = vpop.f32.mrb[122].mxu0 }
 0x331   : > { %v1458_v63 = vadd.f32 %v1457_v61, %v3587_v12  ;;  %v1459_v1 = vpop.f32.mrb[123].mxu0 }
 0x332   : > { %v1460_v2 = vadd.f32 %v1459_v1, %v3590_v13  ;;  %1774 = vmatprep.mubr.f32.mxu1 %v1531_v60 }
 0x333   : > { %1775 = vmatmul.mubr.f32.gmra.mrb[106].mxu1 %v1530_v62  ;;  %v1532_v5 = vmax.f32 %v1458_v63, 0.0 }
 0x334   : > { %v1533_v3 = vmax.f32 %v1460_v2, 0.0  ;;  %v1463_v4 = vpop.f32.mrb[124].mxu0 }
 0x335   : > { %v1464_v6 = vadd.f32 %v1463_v4, %v3587_v12  ;;  %v1465_v42 = vpop.f32.mrb[125].mxu0 }
 0x336   : > { %v1466_v44 = vadd.f32 %v1465_v42, %v3590_v13  ;;  %1779 = vmatprep.mubr.f32.mxu1 %v1533_v3 }
 0x337   : > { %1780 = vmatmul.mubr.f32.gmra.mrb[108].mxu1 %v1532_v5  ;;  %v1534_v7 = vmax.f32 %v1464_v6, 0.0 }
 0x338   : > { %v1535_v10 = vmax.f32 %v1466_v44, 0.0  ;;  %v1469_v11 = vpop.f32.mrb[126].mxu0 }
 0x339   : > { %v1470_v14 = vadd.f32 %v1469_v11, %v3587_v12  ;;  %v1471_v8 = vpop.f32.mrb[127].mxu0  ;;  %v3665_v12 = vld [vmem:[%s4033_s5 + $0x4] ss:$0 sm:$0xff] }
 0x33a   : > { %v1472_v15 = vadd.f32 %v1471_v8, %v3590_v13  ;;  %1784 = vmatprep.mubr.f32.mxu1 %v1535_v10 }
 0x33b   : > { %1785 = vmatmul.mubr.f32.gmra.mrb[110].mxu1 %v1534_v7  ;;  %v1536_v17 = vmax.f32 %v1470_v14, 0.0 }
 0x33c   : > { %v1537_v16 = vmax.f32 %v1472_v15, 0.0 }
 0x33e   : > { %1789 = vmatprep.mubr.f32.mxu1 %v1537_v16 }
 0x33f   : > { %1790 = vmatmul.mubr.f32.gmra.mrb[112].mxu1 %v1536_v17 }
 0x396   : > { %v1636_v0 = vpop.f32.mrb[128].mxu0 }
 0x397   : > { %v1637_v19 = vadd.f32 %v1636_v0, %v3659_v18  ;;  %v1638_v20 = vpop.f32.mrb[129].mxu0 }
 0x399   : > { %v1795_v13 = vmax.f32 %v1637_v19, 0.0 }
 0x39a   : > { %v1641_v34 = vpop.f32.mrb[130].mxu0 }
 0x39b   : > { %v1642_v21 = vadd.f32 %v1641_v34, %v3659_v18  ;;  %v1643_v36 = vpop.f32.mrb[131].mxu0  ;;  %v3669_v22 = vadd.f32 %v1795_v13, %v3665_v12 }
 0x39d   : > { %v1796_v23 = vmax.f32 %v1642_v21, 0.0  ;;  %1859 = vmax.xlane.f32.xlu0 %v3669_v22 }
 0x39e   : > { %v1646_v24 = vpop.f32.mrb[132].mxu0 }
 0x39f   : > { %v1647_v25 = vadd.f32 %v1646_v24, %v3659_v18  ;;  %v1648_v26 = vpop.f32.mrb[133].mxu0  ;;  %v3674_v27 = vadd.f32 %v1796_v23, %v3665_v12 }
 0x3a1   : > { %v1797_v28 = vmax.f32 %v1647_v25, 0.0  ;;  %1861 = vmax.xlane.f32.xlu0 %v3674_v27 }
 0x3a2   : > { %v1651_v9 = vpop.f32.mrb[134].mxu0 }
 0x3a3   : > { %v1652_v29 = vadd.f32 %v1651_v9, %v3659_v18  ;;  %v1653_v30 = vpop.f32.mrb[135].mxu0  ;;  %v3679_v31 = vadd.f32 %v1797_v28, %v3665_v12 }
 0x3a5   : > { %v1798_v32 = vmax.f32 %v1652_v29, 0.0  ;;  %1863 = vmax.xlane.f32.xlu1 %v3679_v31 }
 0x3a6   : > { %v1656_v33 = vpop.f32.mrb[136].mxu0 }
 0x3a7   : > { %v1657_v35 = vadd.f32 %v1656_v33, %v3659_v18  ;;  %v1658_v37 = vpop.f32.mrb[137].mxu0  ;;  %v3684_v38 = vadd.f32 %v1798_v32, %v3665_v12 }
 0x3a9   : > { %v1799_v39 = vmax.f32 %v1657_v35, 0.0  ;;  %1865 = vmax.xlane.f32.xlu1 %v3684_v38 }
 0x3aa   : > { %v1661_v40 = vpop.f32.mrb[138].mxu0 }
 0x3ab   : > { %v1662_v41 = vadd.f32 %v1661_v40, %v3659_v18  ;;  %v1663_v43 = vpop.f32.mrb[139].mxu0  ;;  %v3689_v45 = vadd.f32 %v1799_v39, %v3665_v12 }
 0x3ad   : > { %v1800_v46 = vmax.f32 %v1662_v41, 0.0  ;;  %1867 = vmax.xlane.f32.xlu0 %v3689_v45 }
 0x3ae   : > { %v1666_v47 = vpop.f32.mrb[140].mxu0 }
 0x3af   : > { %v1667_v48 = vadd.f32 %v1666_v47, %v3659_v18  ;;  %v1668_v49 = vpop.f32.mrb[141].mxu0  ;;  %v3694_v50 = vadd.f32 %v1800_v46, %v3665_v12 }
 0x3b1   : > { %v1801_v51 = vmax.f32 %v1667_v48, 0.0  ;;  %1869 = vmax.xlane.f32.xlu1 %v3694_v50 }
 0x3b2   : > { %v1671_v52 = vpop.f32.mrb[64].mxu1 }
 0x3b3   : > { %v1672_v53 = vadd.f32 %v1671_v52, %v3659_v18  ;;  %v1673_v54 = vpop.f32.mrb[65].mxu1  ;;  %v3699_v55 = vadd.f32 %v1801_v51, %v3665_v12 }
 0x3b5   : > { %v1802_v56 = vmax.f32 %v1672_v53, 0.0  ;;  %1871 = vmax.xlane.f32.xlu0 %v3699_v55 }
 0x3b6   : > { %v1676_v57 = vpop.f32.mrb[66].mxu1 }
 0x3b7   : > { %v1677_v58 = vadd.f32 %v1676_v57, %v3659_v18  ;;  %v1678_v59 = vpop.f32.mrb[67].mxu1  ;;  %v3704_v60 = vadd.f32 %v1802_v56, %v3665_v12 }
 0x3b9   : > { %v1803_v61 = vmax.f32 %v1677_v58, 0.0  ;;  %1873 = vmax.xlane.f32.xlu1 %v3704_v60 }
 0x3ba   : > { %v1681_v62 = vpop.f32.mrb[68].mxu1 }
 0x3bb   : > { %v1682_v63 = vadd.f32 %v1681_v62, %v3659_v18  ;;  %v1683_v1 = vpop.f32.mrb[69].mxu1  ;;  %v3709_v2 = vadd.f32 %v1803_v61, %v3665_v12 }
 0x3bd   : > { %v1804_v3 = vmax.f32 %v1682_v63, 0.0  ;;  %1875 = vmax.xlane.f32.xlu0 %v3709_v2 }
 0x3be   : > { %v1686_v4 = vpop.f32.mrb[70].mxu1 }
 0x3bf   : > { %v1687_v5 = vadd.f32 %v1686_v4, %v3659_v18  ;;  %v1688_v6 = vpop.f32.mrb[71].mxu1  ;;  %v3714_v42 = vadd.f32 %v1804_v3, %v3665_v12 }
 0x3c1   : > { %v1805_v44 = vmax.f32 %v1687_v5, 0.0  ;;  %1877 = vmax.xlane.f32.xlu1 %v3714_v42 }
 0x3c2   : > { %v1691_v10 = vpop.f32.mrb[72].mxu1 }
 0x3c3   : > { %v1692_v11 = vadd.f32 %v1691_v10, %v3659_v18  ;;  %v1693_v7 = vpop.f32.mrb[73].mxu1  ;;  %v3719_v14 = vadd.f32 %v1805_v44, %v3665_v12 }
 0x3c5   : > { %v1806_v8 = vmax.f32 %v1692_v11, 0.0  ;;  %1879 = vmax.xlane.f32.xlu0 %v3719_v14 }
 0x3c6   : > { %v1696_v15 = vpop.f32.mrb[74].mxu1 }
 0x3c7   : > { %v1697_v16 = vadd.f32 %v1696_v15, %v3659_v18  ;;  %v1698_v17 = vpop.f32.mrb[75].mxu1  ;;  %v3724_v0 = vadd.f32 %v1806_v8, %v3665_v12 }
 0x3c9   : > { %v1807_v19 = vmax.f32 %v1697_v16, 0.0  ;;  %1881 = vmax.xlane.f32.xlu1 %v3724_v0 }
 0x3ca   : > { %v1701_v20 = vpop.f32.mrb[76].mxu1 }
 0x3cb   : > { %v1702_v13 = vadd.f32 %v1701_v20, %v3659_v18  ;;  %v1703_v34 = vpop.f32.mrb[77].mxu1  ;;  %v3729_v21 = vadd.f32 %v1807_v19, %v3665_v12 }
 0x3cd   : > { %v1808_v36 = vmax.f32 %v1702_v13, 0.0  ;;  %1883 = vmax.xlane.f32.xlu0 %v3729_v21 }
 0x3ce   : > { %v1706_v23 = vpop.f32.mrb[78].mxu1 }
 0x3cf   : > { %v1707_v24 = vadd.f32 %v1706_v23, %v3659_v18  ;;  %v1708_v25 = vpop.f32.mrb[79].mxu1  ;;  %v3734_v26 = vadd.f32 %v1808_v36, %v3665_v12 }
 0x3d1   : > { %v1809_v28 = vmax.f32 %v1707_v24, 0.0  ;;  %1885 = vmax.xlane.f32.xlu1 %v3734_v26 }
 0x3d2   : > { %v1711_v9 = vpop.f32.mrb[80].mxu1 }
 0x3d3   : > { %v1712_v29 = vadd.f32 %v1711_v9, %v3659_v18  ;;  %v1713_v30 = vpop.f32.mrb[81].mxu1  ;;  %v3739_v32 = vadd.f32 %v1809_v28, %v3665_v12 }
 0x3d5   : > { %v1810_v33 = vmax.f32 %v1712_v29, 0.0  ;;  %1887 = vmax.xlane.f32.xlu0 %v3739_v32 }
 0x3d6   : > { %v1716_v35 = vpop.f32.mrb[82].mxu1 }
 0x3d7   : > { %v1717_v37 = vadd.f32 %v1716_v35, %v3659_v18  ;;  %v1718_v39 = vpop.f32.mrb[83].mxu1  ;;  %v3744_v40 = vadd.f32 %v1810_v33, %v3665_v12 }
 0x3d9   : > { %v1811_v41 = vmax.f32 %v1717_v37, 0.0  ;;  %1889 = vmax.xlane.f32.xlu1 %v3744_v40 }
 0x3da   : > { %v1721_v43 = vpop.f32.mrb[84].mxu1 }
 0x3db   : > { %v1722_v46 = vadd.f32 %v1721_v43, %v3659_v18  ;;  %v1723_v47 = vpop.f32.mrb[85].mxu1  ;;  %v3749_v48 = vadd.f32 %v1811_v41, %v3665_v12 }
 0x3dd   : > { %v1812_v49 = vmax.f32 %v1722_v46, 0.0  ;;  %1891 = vmax.xlane.f32.xlu0 %v3749_v48 }
 0x3de   : > { %v1726_v51 = vpop.f32.mrb[86].mxu1 }
 0x3df   : > { %v1727_v52 = vadd.f32 %v1726_v51, %v3659_v18  ;;  %v1728_v53 = vpop.f32.mrb[87].mxu1  ;;  %v3754_v54 = vadd.f32 %v1812_v49, %v3665_v12 }
 0x3e1   : > { %v1813_v56 = vmax.f32 %v1727_v52, 0.0  ;;  %1893 = vmax.xlane.f32.xlu1 %v3754_v54 }
 0x3e2   : > { %v1731_v57 = vpop.f32.mrb[88].mxu1 }
 0x3e3   : > { %v1732_v58 = vadd.f32 %v1731_v57, %v3659_v18  ;;  %v1733_v59 = vpop.f32.mrb[89].mxu1  ;;  %v3759_v61 = vadd.f32 %v1813_v56, %v3665_v12 }
 0x3e5   : > { %v1814_v62 = vmax.f32 %v1732_v58, 0.0  ;;  %1895 = vmax.xlane.f32.xlu0 %v3759_v61 }
 0x3e6   : > { %v1736_v63 = vpop.f32.mrb[90].mxu1 }
 0x3e7   : > { %v1737_v1 = vadd.f32 %v1736_v63, %v3659_v18  ;;  %v1738_v3 = vpop.f32.mrb[91].mxu1  ;;  %v3764_v4 = vadd.f32 %v1814_v62, %v3665_v12 }
 0x3e9   : > { %v1815_v5 = vmax.f32 %v1737_v1, 0.0  ;;  %1897 = vmax.xlane.f32.xlu1 %v3764_v4 }
 0x3ea   : > { %v1741_v6 = vpop.f32.mrb[92].mxu1 }
 0x3eb   : > { %v1742_v44 = vadd.f32 %v1741_v6, %v3659_v18  ;;  %v1743_v10 = vpop.f32.mrb[93].mxu1  ;;  %v3769_v11 = vadd.f32 %v1815_v5, %v3665_v12 }
 0x3ed   : > { %v1816_v7 = vmax.f32 %v1742_v44, 0.0  ;;  %1899 = vmax.xlane.f32.xlu0 %v3769_v11 }
 0x3ee   : > { %v1746_v8 = vpop.f32.mrb[94].mxu1 }
 0x3ef   : > { %v1747_v15 = vadd.f32 %v1746_v8, %v3659_v18  ;;  %v1748_v16 = vpop.f32.mrb[95].mxu1  ;;  %v3774_v17 = vadd.f32 %v1816_v7, %v3665_v12 }
 0x3f1   : > { %v1817_v19 = vmax.f32 %v1747_v15, 0.0  ;;  %1901 = vmax.xlane.f32.xlu1 %v3774_v17 }
 0x3f2   : > { %v1751_v20 = vpop.f32.mrb[96].mxu1 }
 0x3f3   : > { %v1752_v13 = vadd.f32 %v1751_v20, %v3659_v18  ;;  %v1753_v34 = vpop.f32.mrb[97].mxu1  ;;  %v3779_v36 = vadd.f32 %v1817_v19, %v3665_v12 }
 0x3f5   : > { %v1818_v23 = vmax.f32 %v1752_v13, 0.0  ;;  %1903 = vmax.xlane.f32.xlu0 %v3779_v36 }
 0x3f6   : > { %v1756_v24 = vpop.f32.mrb[98].mxu1 }
 0x3f7   : > { %v1757_v25 = vadd.f32 %v1756_v24, %v3659_v18  ;;  %v1758_v28 = vpop.f32.mrb[99].mxu1  ;;  %v3784_v9 = vadd.f32 %v1818_v23, %v3665_v12 }
 0x3f9   : > { %v1819_v29 = vmax.f32 %v1757_v25, 0.0  ;;  %1905 = vmax.xlane.f32.xlu1 %v3784_v9 }
 0x3fa   : > { %v1761_v30 = vpop.f32.mrb[100].mxu1 }
 0x3fb   : > { %v1762_v33 = vadd.f32 %v1761_v30, %v3659_v18  ;;  %v1763_v35 = vpop.f32.mrb[101].mxu1  ;;  %v3789_v37 = vadd.f32 %v1819_v29, %v3665_v12 }
 0x3fd   : > { %v1820_v39 = vmax.f32 %v1762_v33, 0.0  ;;  %1907 = vmax.xlane.f32.xlu0 %v3789_v37 }
 0x3fe   : > { %v1766_v41 = vpop.f32.mrb[102].mxu1 }
 0x3ff   : > { %v1767_v43 = vadd.f32 %v1766_v41, %v3659_v18  ;;  %v1768_v46 = vpop.f32.mrb[103].mxu1  ;;  %v3794_v47 = vadd.f32 %v1820_v39, %v3665_v12 }
 0x401   : > { %v1821_v49 = vmax.f32 %v1767_v43, 0.0  ;;  %1909 = vmax.xlane.f32.xlu1 %v3794_v47 }
 0x402   : > { %v1771_v51 = vpop.f32.mrb[104].mxu1 }
 0x403   : > { %v1772_v52 = vadd.f32 %v1771_v51, %v3659_v18  ;;  %v1773_v53 = vpop.f32.mrb[105].mxu1  ;;  %v3799_v56 = vadd.f32 %v1821_v49, %v3665_v12 }
 0x405   : > { %v1822_v57 = vmax.f32 %v1772_v52, 0.0  ;;  %1911 = vmax.xlane.f32.xlu0 %v3799_v56 }
 0x406   : > { %v1776_v58 = vpop.f32.mrb[106].mxu1 }
 0x407   : > { %v1777_v59 = vadd.f32 %v1776_v58, %v3659_v18  ;;  %v1778_v62 = vpop.f32.mrb[107].mxu1  ;;  %v3804_v63 = vadd.f32 %v1822_v57, %v3665_v12 }
 0x409   : > { %v1823_v1 = vmax.f32 %v1777_v59, 0.0  ;;  %1913 = vmax.xlane.f32.xlu1 %v3804_v63 }
 0x40a   : > { %v1781_v3 = vpop.f32.mrb[108].mxu1 }
 0x40b   : > { %v1782_v5 = vadd.f32 %v1781_v3, %v3659_v18  ;;  %v1783_v6 = vpop.f32.mrb[109].mxu1  ;;  %v3809_v44 = vadd.f32 %v1823_v1, %v3665_v12 }
 0x40d   : > { %v1824_v10 = vmax.f32 %v1782_v5, 0.0  ;;  %1915 = vmax.xlane.f32.xlu0 %v3809_v44 }
 0x40e   : > { %v1786_v7 = vpop.f32.mrb[110].mxu1 }
 0x40f   : > { %v1787_v8 = vadd.f32 %v1786_v7, %v3659_v18  ;;  %v1788_v15 = vpop.f32.mrb[111].mxu1  ;;  %v3814_v16 = vadd.f32 %v1824_v10, %v3665_v12 }
 0x411   : > { %v1825_v19 = vmax.f32 %v1787_v8, 0.0  ;;  %1917 = vmax.xlane.f32.xlu1 %v3814_v16 }
 0x412   : > { %v1791_v20 = vpop.f32.mrb[112].mxu1 }
 0x413   : > { %v1792_v13 = vadd.f32 %v1791_v20, %v3659_v18  ;;  %v1793_v34 = vpop.f32.mrb[113].mxu1  ;;  %v3819_v23 = vadd.f32 %v1825_v19, %v3665_v12 }
 0x415   : > { %v1826_v24 = vmax.f32 %v1792_v13, 0.0  ;;  %1919 = vmax.xlane.f32.xlu0 %v3819_v23 }
 0x417   : > { %v3823_v25 = vadd.f32 %v1826_v24, %v3665_v12 }
 0x419   : > { %1921 = vmax.xlane.f32.xlu1 %v3823_v25 }
 0x42a   : > { %v1860_v28 = vpop.xlane.xlu0 %1859 }
 0x42b   : > { %v1923_v29 = vsub.f32 %v3669_v22, %v1860_v28 }
 0x42d   : > { %v1955_v30 = vmul.f32 1.442695, %v1923_v29 }
 0x42e   : > { %v1862_v33 = vpop.xlane.xlu0 %1861 }
 0x42f   : > { %2629 = vpow2.f32 %v1955_v30  ;;  %v1924_v18 = vsub.f32 %v3674_v27, %v1862_v33 }
 0x431   : > { %v1957_v35 = vmul.f32 1.442695, %v1924_v18 }
 0x432   : > { %v1864_v39 = vpop.xlane.xlu1 %1863 }
 0x433   : > { %2631 = vpow2.f32 %v1957_v35  ;;  %v1925_v41 = vsub.f32 %v3679_v31, %v1864_v39 }
 0x435   : > { %v1959_v43 = vmul.f32 1.442695, %v1925_v41 }
 0x436   : > { %v1866_v46 = vpop.xlane.xlu1 %1865 }
 0x437   : > { %2633 = vpow2.f32 %v1959_v43  ;;  %v1926_v12 = vsub.f32 %v3684_v38, %v1866_v46 }
 0x439   : > { %v3830_v49 = vpop.eup %2629  ;;  %v1961_v51 = vmul.f32 1.442695, %v1926_v12 }
 0x43a   : > { %2019 = vadd.xlane.f32.xlu0 %v3830_v49  ;;  %v1868_v22 = vpop.xlane.xlu0 %1867 }
 0x43b   : > { %2635 = vpow2.f32 %v1961_v51  ;;  %v1927_v52 = vsub.f32 %v3689_v45, %v1868_v22 }
 0x43d   : > { %v3834_v27 = vpop.eup %2631  ;;  %v1963_v53 = vmul.f32 1.442695, %v1927_v52 }
 0x43e   : > { %v1870_v57 = vpop.xlane.xlu1 %1869  ;;  %2021 = vadd.xlane.f32.xlu1 %v3834_v27 }
 0x43f   : > { %2637 = vpow2.f32 %v1963_v53  ;;  %v1928_v31 = vsub.f32 %v3694_v50, %v1870_v57 }
 0x441   : > { %v3838_v58 = vpop.eup %2633  ;;  %v1965_v38 = vmul.f32 1.442695, %v1928_v31 }
 0x442   : > { %2023 = vadd.xlane.f32.xlu0 %v3838_v58  ;;  %v1872_v59 = vpop.xlane.xlu0 %1871 }
 0x443   : > { %2639 = vpow2.f32 %v1965_v38  ;;  %v1929_v62 = vsub.f32 %v3699_v55, %v1872_v59 }
 0x445   : > { %v3842_v1 = vpop.eup %2635  ;;  %v1967_v45 = vmul.f32 1.442695, %v1929_v62 }
 0x446   : > { %v1874_v3 = vpop.xlane.xlu1 %1873  ;;  %2025 = vadd.xlane.f32.xlu1 %v3842_v1 }
 0x447   : > { %2641 = vpow2.f32 %v1967_v45  ;;  %v1930_v5 = vsub.f32 %v3704_v60, %v1874_v3 }
 0x449   : > { %v3846_v6 = vpop.eup %2637  ;;  %v1969_v50 = vmul.f32 1.442695, %v1930_v5 }
 0x44a   : > { %2027 = vadd.xlane.f32.xlu0 %v3846_v6  ;;  %v1876_v10 = vpop.xlane.xlu0 %1875 }
 0x44b   : > { %2643 = vpow2.f32 %v1969_v50  ;;  %v1931_v7 = vsub.f32 %v3709_v2, %v1876_v10 }
 0x44d   : > { %v3850_v8 = vpop.eup %2639  ;;  %v1971_v55 = vmul.f32 1.442695, %v1931_v7 }
 0x44e   : > { %v1878_v15 = vpop.xlane.xlu1 %1877  ;;  %2029 = vadd.xlane.f32.xlu1 %v3850_v8 }
 0x44f   : > { %2645 = vpow2.f32 %v1971_v55  ;;  %v1932_v19 = vsub.f32 %v3714_v42, %v1878_v15 }
 0x451   : > { %v3854_v20 = vpop.eup %2641  ;;  %v1973_v60 = vmul.f32 1.442695, %v1932_v19 }
 0x452   : > { %2031 = vadd.xlane.f32.xlu0 %v3854_v20  ;;  %v1880_v13 = vpop.xlane.xlu0 %1879 }
 0x453   : > { %2647 = vpow2.f32 %v1973_v60  ;;  %v1933_v34 = vsub.f32 %v3719_v14, %v1880_v13 }
 0x455   : > { %v3858_v24 = vpop.eup %2643  ;;  %v1975_v2 = vmul.f32 1.442695, %v1933_v34 }
 0x456   : > { %v1882_v28 = vpop.xlane.xlu1 %1881  ;;  %2033 = vadd.xlane.f32.xlu1 %v3858_v24 }
 0x457   : > { %2649 = vpow2.f32 %v1975_v2  ;;  %v1934_v29 = vsub.f32 %v3724_v0, %v1882_v28 }
 0x459   : > { %v3862_v30 = vpop.eup %2645  ;;  %v1977_v42 = vmul.f32 1.442695, %v1934_v29 }
 0x45a   : > { %2035 = vadd.xlane.f32.xlu0 %v3862_v30  ;;  %v1884_v33 = vpop.xlane.xlu0 %1883 }
 0x45b   : > { %2651 = vpow2.f32 %v1977_v42  ;;  %v1935_v18 = vsub.f32 %v3729_v21, %v1884_v33 }
 0x45d   : > { %v3866_v35 = vpop.eup %2647  ;;  %v1979_v14 = vmul.f32 1.442695, %v1935_v18 }
 0x45e   : > { %v1886_v39 = vpop.xlane.xlu1 %1885  ;;  %2037 = vadd.xlane.f32.xlu1 %v3866_v35 }
 0x45f   : > { %2653 = vpow2.f32 %v1979_v14  ;;  %v1936_v41 = vsub.f32 %v3734_v26, %v1886_v39 }
 0x461   : > { %v3870_v43 = vpop.eup %2649  ;;  %v1981_v0 = vmul.f32 1.442695, %v1936_v41 }
 0x462   : > { %2039 = vadd.xlane.f32.xlu0 %v3870_v43  ;;  %v1888_v46 = vpop.xlane.xlu0 %1887 }
 0x463   : > { %2655 = vpow2.f32 %v1981_v0  ;;  %v1937_v12 = vsub.f32 %v3739_v32, %v1888_v46 }
 0x465   : > { %v3874_v51 = vpop.eup %2651  ;;  %v1983_v21 = vmul.f32 1.442695, %v1937_v12 }
 0x466   : > { %v1890_v22 = vpop.xlane.xlu1 %1889  ;;  %2041 = vadd.xlane.f32.xlu1 %v3874_v51 }
 0x467   : > { %2657 = vpow2.f32 %v1983_v21  ;;  %v1938_v52 = vsub.f32 %v3744_v40, %v1890_v22 }
 0x469   : > { %v3878_v53 = vpop.eup %2653  ;;  %v1985_v26 = vmul.f32 1.442695, %v1938_v52 }
 0x46a   : > { %2043 = vadd.xlane.f32.xlu0 %v3878_v53  ;;  %v1892_v57 = vpop.xlane.xlu0 %1891 }
 0x46b   : > { %2659 = vpow2.f32 %v1985_v26  ;;  %v1939_v31 = vsub.f32 %v3749_v48, %v1892_v57 }
 0x46d   : > { %v3882_v38 = vpop.eup %2655  ;;  %v1987_v32 = vmul.f32 1.442695, %v1939_v31 }
 0x46e   : > { %v1894_v59 = vpop.xlane.xlu1 %1893  ;;  %2045 = vadd.xlane.f32.xlu1 %v3882_v38 }
 0x46f   : > { %2661 = vpow2.f32 %v1987_v32  ;;  %v1940_v62 = vsub.f32 %v3754_v54, %v1894_v59 }
 0x471   : > { %v3886_v45 = vpop.eup %2657  ;;  %v1989_v40 = vmul.f32 1.442695, %v1940_v62 }
 0x472   : > { %2047 = vadd.xlane.f32.xlu0 %v3886_v45  ;;  %v1896_v3 = vpop.xlane.xlu0 %1895 }
 0x473   : > { %2663 = vpow2.f32 %v1989_v40  ;;  %v1941_v5 = vsub.f32 %v3759_v61, %v1896_v3 }
 0x475   : > { %v3890_v50 = vpop.eup %2659  ;;  %v1991_v48 = vmul.f32 1.442695, %v1941_v5 }
 0x476   : > { %v1898_v10 = vpop.xlane.xlu1 %1897  ;;  %2049 = vadd.xlane.f32.xlu1 %v3890_v50 }
 0x477   : > { %2665 = vpow2.f32 %v1991_v48  ;;  %v1942_v7 = vsub.f32 %v3764_v4, %v1898_v10 }
 0x479   : > { %v3894_v55 = vpop.eup %2661  ;;  %v1993_v54 = vmul.f32 1.442695, %v1942_v7 }
 0x47a   : > { %2051 = vadd.xlane.f32.xlu0 %v3894_v55  ;;  %v1900_v15 = vpop.xlane.xlu0 %1899 }
 0x47b   : > { %2667 = vpow2.f32 %v1993_v54  ;;  %v1943_v19 = vsub.f32 %v3769_v11, %v1900_v15 }
 0x47d   : > { %v3898_v60 = vpop.eup %2663  ;;  %v1995_v61 = vmul.f32 1.442695, %v1943_v19 }
 0x47e   : > { %v1902_v13 = vpop.xlane.xlu1 %1901  ;;  %2053 = vadd.xlane.f32.xlu1 %v3898_v60 }
 0x47f   : > { %2669 = vpow2.f32 %v1995_v61  ;;  %v1944_v34 = vsub.f32 %v3774_v17, %v1902_v13 }
 0x481   : > { %v3902_v2 = vpop.eup %2665  ;;  %v1997_v4 = vmul.f32 1.442695, %v1944_v34 }
 0x482   : > { %2055 = vadd.xlane.f32.xlu0 %v3902_v2  ;;  %v1904_v28 = vpop.xlane.xlu0 %1903 }
 0x483   : > { %2671 = vpow2.f32 %v1997_v4  ;;  %v1945_v29 = vsub.f32 %v3779_v36, %v1904_v28 }
 0x485   : > { %v3906_v42 = vpop.eup %2667  ;;  %v1999_v11 = vmul.f32 1.442695, %v1945_v29 }
 0x486   : > { %v1906_v33 = vpop.xlane.xlu1 %1905  ;;  %2057 = vadd.xlane.f32.xlu1 %v3906_v42 }
 0x487   : > { %2673 = vpow2.f32 %v1999_v11  ;;  %v1946_v18 = vsub.f32 %v3784_v9, %v1906_v33 }
 0x489   : > { %v3910_v14 = vpop.eup %2669  ;;  %v2001_v17 = vmul.f32 1.442695, %v1946_v18 }
 0x48a   : > { %2059 = vadd.xlane.f32.xlu0 %v3910_v14  ;;  %v1908_v39 = vpop.xlane.xlu0 %1907 }
 0x48b   : > { %2675 = vpow2.f32 %v2001_v17  ;;  %v1947_v41 = vsub.f32 %v3789_v37, %v1908_v39 }
 0x48d   : > { %v3914_v0 = vpop.eup %2671  ;;  %v2003_v36 = vmul.f32 1.442695, %v1947_v41 }
 0x48e   : > { %v1910_v46 = vpop.xlane.xlu1 %1909  ;;  %2061 = vadd.xlane.f32.xlu1 %v3914_v0 }
 0x48f   : > { %2677 = vpow2.f32 %v2003_v36  ;;  %v1948_v12 = vsub.f32 %v3794_v47, %v1910_v46 }
 0x491   : > { %v3918_v21 = vpop.eup %2673  ;;  %v2005_v9 = vmul.f32 1.442695, %v1948_v12 }
 0x492   : > { %2063 = vadd.xlane.f32.xlu0 %v3918_v21  ;;  %v1912_v22 = vpop.xlane.xlu0 %1911 }
 0x493   : > { %2679 = vpow2.f32 %v2005_v9  ;;  %v1949_v52 = vsub.f32 %v3799_v56, %v1912_v22 }
 0x495   : > { %v3922_v26 = vpop.eup %2675  ;;  %v2007_v37 = vmul.f32 1.442695, %v1949_v52 }
 0x496   : > { %v1914_v57 = vpop.xlane.xlu1 %1913  ;;  %2065 = vadd.xlane.f32.xlu1 %v3922_v26 }
 0x497   : > { %2681 = vpow2.f32 %v2007_v37  ;;  %v1950_v31 = vsub.f32 %v3804_v63, %v1914_v57 }
 0x499   : > { %v3926_v32 = vpop.eup %2677  ;;  %v2009_v47 = vmul.f32 1.442695, %v1950_v31 }
 0x49a   : > { %2067 = vadd.xlane.f32.xlu0 %v3926_v32  ;;  %v1916_v59 = vpop.xlane.xlu0 %1915 }
 0x49b   : > { %2683 = vpow2.f32 %v2009_v47  ;;  %v1951_v62 = vsub.f32 %v3809_v44, %v1916_v59 }
 0x49d   : > { %v3930_v40 = vpop.eup %2679  ;;  %v2011_v56 = vmul.f32 1.442695, %v1951_v62 }
 0x49e   : > { %v1918_v3 = vpop.xlane.xlu1 %1917  ;;  %2069 = vadd.xlane.f32.xlu1 %v3930_v40 }
 0x49f   : > { %2685 = vpow2.f32 %v2011_v56  ;;  %v1952_v5 = vsub.f32 %v3814_v16, %v1918_v3 }
 0x4a1   : > { %v3934_v48 = vpop.eup %2681  ;;  %v2013_v63 = vmul.f32 1.442695, %v1952_v5 }
 0x4a2   : > { %2071 = vadd.xlane.f32.xlu0 %v3934_v48  ;;  %v1920_v10 = vpop.xlane.xlu0 %1919 }
 0x4a3   : > { %2687 = vpow2.f32 %v2013_v63  ;;  %v1953_v7 = vsub.f32 %v3819_v23, %v1920_v10 }
 0x4a5   : > { %v3938_v54 = vpop.eup %2683  ;;  %v2015_v44 = vmul.f32 1.442695, %v1953_v7 }
 0x4a6   : > { %v1922_v15 = vpop.xlane.xlu1 %1921  ;;  %2073 = vadd.xlane.f32.xlu1 %v3938_v54 }
 0x4a7   : > { %2689 = vpow2.f32 %v2015_v44  ;;  %v1954_v19 = vsub.f32 %v3823_v25, %v1922_v15 }
 0x4a9   : > { %v3942_v61 = vpop.eup %2685  ;;  %v2017_v16 = vmul.f32 1.442695, %v1954_v19 }
 0x4aa   : > { %2075 = vadd.xlane.f32.xlu0 %v3942_v61 }
 0x4ab   : > { %2691 = vpow2.f32 %v2017_v16 }
 0x4ad   : > { %v3945_v13 = vpop.eup %2687 }
 0x4ae   : > { %2077 = vadd.xlane.f32.xlu1 %v3945_v13 }
 0x4b1   : > { %v3948_v23 = vpop.eup %2689 }
 0x4b2   : > { %2079 = vadd.xlane.f32.xlu0 %v3948_v23 }
 0x4b5   : > { %v3951_v34 = vpop.eup %2691 }
 0x4b6   : > { %2081 = vadd.xlane.f32.xlu1 %v3951_v34 }
 0x4c7   : > { %v2020_v25 = vpop.xlane.xlu0 %2019 }
 0x4c8   : > { %2693 = vrcp.f32 %v2020_v25 }
 0x4cb   : > { %v2022_v4 = vpop.xlane.xlu1 %2021 }
 0x4cc   : > { %2695 = vrcp.f32 %v2022_v4 }
 0x4cf   : > { %v2024_v28 = vpop.xlane.xlu0 %2023 }
 0x4d0   : > { %2697 = vrcp.f32 %v2024_v28 }
 0x4d2   : > { %v2694_v29 = vpop.eup %2693 }
 0x4d3   : > { %v2115_v11 = vmul.f32 %v2694_v29, %v2020_v25  ;;  %v2026_v33 = vpop.xlane.xlu1 %2025 }
 0x4d4   : > { %2699 = vrcp.f32 %v2026_v33 }
 0x4d5   : > { %v2147_v18 = vsub.f32 2.0, %v2115_v11 }
 0x4d6   : > { %v2696_v17 = vpop.eup %2695 }
 0x4d7   : > { %v2179_v39 = vmul.f32 %v2694_v29, %v2147_v18  ;;  %v2116_v41 = vmul.f32 %v2696_v17, %v2022_v4  ;;  %v2028_v36 = vpop.xlane.xlu0 %2027 }
 0x4d8   : > { %2701 = vrcp.f32 %v2028_v36 }
 0x4d9   : > { %v2211_v46 = vmul.f32 %v3830_v49, %v2179_v39  ;;  %v2148_v12 = vsub.f32 2.0, %v2116_v41 }
 0x4da   : > { %v2698_v9 = vpop.eup %2697 }
 0x4db   : > { %2243 = vst [vmem:[%s3959_s15] sm:$0xff] %v2211_v46  ;;  %v2180_v22 = vmul.f32 %v2696_v17, %v2148_v12  ;;  %v2117_v52 = vmul.f32 %v2698_v9, %v2024_v28  ;;  %v2030_v37 = vpop.xlane.xlu1 %2029 }
 0x4dc   : > { %2703 = vrcp.f32 %v2030_v37 }
 0x4dd   : > { %v2212_v57 = vmul.f32 %v3834_v27, %v2180_v22  ;;  %v2149_v31 = vsub.f32 2.0, %v2117_v52 }
 0x4de   : > { %v2700_v47 = vpop.eup %2699 }
 0x4df   : > { %2244 = vst [vmem:[%s3959_s15 + $0x8] sm:$0xff] %v2212_v57  ;;  %v2181_v59 = vmul.f32 %v2698_v9, %v2149_v31  ;;  %v2118_v62 = vmul.f32 %v2700_v47, %v2026_v33  ;;  %v2032_v56 = vpop.xlane.xlu0 %2031 }
 0x4e0   : > { %2705 = vrcp.f32 %v2032_v56 }
 0x4e1   : > { %v2213_v49 = vmul.f32 %v3838_v58, %v2181_v59  ;;  %v2150_v3 = vsub.f32 2.0, %v2118_v62 }
 0x4e2   : > { %v2702_v5 = vpop.eup %2701 }
 0x4e3   : > { %2245 = vst [vmem:[%s3959_s15 + $0x10] sm:$0xff] %v2213_v49  ;;  %v2182_v63 = vmul.f32 %v2700_v47, %v2150_v3  ;;  %v2119_v10 = vmul.f32 %v2702_v5, %v2028_v36  ;;  %v2034_v7 = vpop.xlane.xlu1 %2033 }
 0x4e4   : > { %2707 = vrcp.f32 %v2034_v7 }
 0x4e5   : > { %v2214_v27 = vmul.f32 %v3842_v1, %v2182_v63  ;;  %v2151_v44 = vsub.f32 2.0, %v2119_v10 }
 0x4e6   : > { %v2704_v15 = vpop.eup %2703 }
 0x4e7   : > { %2246 = vst [vmem:[%s3959_s15 + $0x18] sm:$0xff] %v2214_v27  ;;  %v2183_v19 = vmul.f32 %v2702_v5, %v2151_v44  ;;  %v2120_v16 = vmul.f32 %v2704_v15, %v2030_v37  ;;  %v2036_v25 = vpop.xlane.xlu0 %2035 }
 0x4e8   : > { %2709 = vrcp.f32 %v2036_v25 }
 0x4e9   : > { %v2215_v58 = vmul.f32 %v3846_v6, %v2183_v19  ;;  %v2152_v4 = vsub.f32 2.0, %v2120_v16 }
 0x4ea   : > { %v2706_v28 = vpop.eup %2705 }
 0x4eb   : > { %2247 = vst [vmem:[%s3959_s15 + $0x20] sm:$0xff] %v2215_v58  ;;  %v2184_v29 = vmul.f32 %v2704_v15, %v2152_v4  ;;  %v2121_v11 = vmul.f32 %v2706_v28, %v2032_v56  ;;  %v2038_v33 = vpop.xlane.xlu1 %2037 }
 0x4ec   : > { %2711 = vrcp.f32 %v2038_v33 }
 0x4ed   : > { %v2216_v1 = vmul.f32 %v3850_v8, %v2184_v29  ;;  %v2153_v18 = vsub.f32 2.0, %v2121_v11 }
 0x4ee   : > { %v2708_v17 = vpop.eup %2707 }
 0x4ef   : > { %2248 = vst [vmem:[%s3959_s15 + $0x28] sm:$0xff] %v2216_v1  ;;  %v2185_v39 = vmul.f32 %v2706_v28, %v2153_v18  ;;  %v2122_v41 = vmul.f32 %v2708_v17, %v2034_v7  ;;  %v2040_v36 = vpop.xlane.xlu0 %2039 }
 0x4f0   : > { %2713 = vrcp.f32 %v2040_v36 }
 0x4f1   : > { %v2217_v6 = vmul.f32 %v3854_v20, %v2185_v39  ;;  %v2154_v46 = vsub.f32 2.0, %v2122_v41 }
 0x4f2   : > { %v2710_v12 = vpop.eup %2709 }
 0x4f3   : > { %2249 = vst [vmem:[%s3959_s15 + $0x30] sm:$0xff] %v2217_v6  ;;  %v2186_v9 = vmul.f32 %v2708_v17, %v2154_v46  ;;  %v2123_v22 = vmul.f32 %v2710_v12, %v2036_v25  ;;  %v2042_v52 = vpop.xlane.xlu1 %2041 }
 0x4f4   : > { %2715 = vrcp.f32 %v2042_v52 }
 0x4f5   : > { %v2218_v8 = vmul.f32 %v3858_v24, %v2186_v9  ;;  %v2155_v37 = vsub.f32 2.0, %v2123_v22 }
 0x4f6   : > { %v2712_v57 = vpop.eup %2711 }
 0x4f7   : > { %2250 = vst [vmem:[%s3959_s15 + $0x38] sm:$0xff] %v2218_v8  ;;  %v2187_v31 = vmul.f32 %v2710_v12, %v2155_v37  ;;  %v2124_v47 = vmul.f32 %v2712_v57, %v2038_v33  ;;  %v2044_v59 = vpop.xlane.xlu0 %2043 }
 0x4f8   : > { %2717 = vrcp.f32 %v2044_v59 }
 0x4f9   : > { %v2219_v20 = vmul.f32 %v3862_v30, %v2187_v31  ;;  %v2156_v62 = vsub.f32 2.0, %v2124_v47 }
 0x4fa   : > { %v2714_v56 = vpop.eup %2713 }
 0x4fb   : > { %2251 = vst [vmem:[%s3959_s15 + $0x40] sm:$0xff] %v2219_v20  ;;  %v2188_v49 = vmul.f32 %v2712_v57, %v2156_v62  ;;  %v2125_v3 = vmul.f32 %v2714_v56, %v2040_v36  ;;  %v2046_v5 = vpop.xlane.xlu1 %2045 }
 0x4fc   : > { %2719 = vrcp.f32 %v2046_v5 }
 0x4fd   : > { %v2220_v24 = vmul.f32 %v3866_v35, %v2188_v49  ;;  %v2157_v63 = vsub.f32 2.0, %v2125_v3 }
 0x4fe   : > { %v2716_v10 = vpop.eup %2715 }
 0x4ff   : > { %2252 = vst [vmem:[%s3959_s15 + $0x48] sm:$0xff] %v2220_v24  ;;  %v2189_v7 = vmul.f32 %v2714_v56, %v2157_v63  ;;  %v2126_v27 = vmul.f32 %v2716_v10, %v2042_v52  ;;  %v2048_v44 = vpop.xlane.xlu0 %2047 }
 0x500   : > { %2721 = vrcp.f32 %v2048_v44 }
 0x501   : > { %v2221_v30 = vmul.f32 %v3870_v43, %v2189_v7  ;;  %v2158_v15 = vsub.f32 2.0, %v2126_v27 }
 0x502   : > { %v2718_v19 = vpop.eup %2717 }
 0x503   : > { %2253 = vst [vmem:[%s3959_s15 + $0x50] sm:$0xff] %v2221_v30  ;;  %v2190_v16 = vmul.f32 %v2716_v10, %v2158_v15  ;;  %v2127_v25 = vmul.f32 %v2718_v19, %v2044_v59  ;;  %v2050_v58 = vpop.xlane.xlu1 %2049 }
 0x504   : > { %2723 = vrcp.f32 %v2050_v58 }
 0x505   : > { %v2222_v35 = vmul.f32 %v3874_v51, %v2190_v16  ;;  %v2159_v4 = vsub.f32 2.0, %v2127_v25 }
 0x506   : > { %v2720_v28 = vpop.eup %2719 }
 0x507   : > { %2254 = vst [vmem:[%s3959_s15 + $0x58] sm:$0xff] %v2222_v35  ;;  %v2191_v29 = vmul.f32 %v2718_v19, %v2159_v4  ;;  %v2128_v11 = vmul.f32 %v2720_v28, %v2046_v5  ;;  %v2052_v33 = vpop.xlane.xlu0 %2051 }
 0x508   : > { %2725 = vrcp.f32 %v2052_v33 }
 0x509   : > { %v2223_v43 = vmul.f32 %v3878_v53, %v2191_v29  ;;  %v2160_v1 = vsub.f32 2.0, %v2128_v11 }
 0x50a   : > { %v2722_v18 = vpop.eup %2721 }
 0x50b   : > { %2255 = vst [vmem:[%s3959_s15 + $0x60] sm:$0xff] %v2223_v43  ;;  %v2192_v17 = vmul.f32 %v2720_v28, %v2160_v1  ;;  %v2129_v39 = vmul.f32 %v2722_v18, %v2048_v44  ;;  %v2054_v41 = vpop.xlane.xlu1 %2053 }
 0x50c   : > { %2727 = vrcp.f32 %v2054_v41 }
 0x50d   : > { %v2224_v51 = vmul.f32 %v3882_v38, %v2192_v17  ;;  %v2161_v36 = vsub.f32 2.0, %v2129_v39 }
 0x50e   : > { %v2724_v6 = vpop.eup %2723 }
 0x50f   : > { %2256 = vst [vmem:[%s3959_s15 + $0x68] sm:$0xff] %v2224_v51  ;;  %v2193_v46 = vmul.f32 %v2722_v18, %v2161_v36  ;;  %v2130_v12 = vmul.f32 %v2724_v6, %v2050_v58  ;;  %v2056_v9 = vpop.xlane.xlu0 %2055 }
 0x510   : > { %2729 = vrcp.f32 %v2056_v9 }
 0x511   : > { %v2225_v53 = vmul.f32 %v3886_v45, %v2193_v46  ;;  %v2162_v22 = vsub.f32 2.0, %v2130_v12 }
 0x512   : > { %v2726_v52 = vpop.eup %2725 }
 0x513   : > { %2257 = vst [vmem:[%s3959_s15 + $0x70] sm:$0xff] %v2225_v53  ;;  %v2194_v8 = vmul.f32 %v2724_v6, %v2162_v22  ;;  %v2131_v37 = vmul.f32 %v2726_v52, %v2052_v33  ;;  %v2058_v57 = vpop.xlane.xlu1 %2057 }
 0x514   : > { %2731 = vrcp.f32 %v2058_v57 }
 0x515   : > { %v2226_v38 = vmul.f32 %v3890_v50, %v2194_v8  ;;  %v2163_v31 = vsub.f32 2.0, %v2131_v37 }
 0x516   : > { %v2728_v47 = vpop.eup %2727 }
 0x517   : > { %2258 = vst [vmem:[%s3959_s15 + $0x78] sm:$0xff] %v2226_v38  ;;  %v2195_v59 = vmul.f32 %v2726_v52, %v2163_v31  ;;  %v2132_v20 = vmul.f32 %v2728_v47, %v2054_v41  ;;  %v2060_v62 = vpop.xlane.xlu0 %2059 }
 0x518   : > { %2733 = vrcp.f32 %v2060_v62 }
 0x519   : > { %v2227_v45 = vmul.f32 %v3894_v55, %v2195_v59  ;;  %v2164_v56 = vsub.f32 2.0, %v2132_v20 }
 0x51a   : > { %v2730_v49 = vpop.eup %2729 }
 0x51b   : > { %2259 = vst [vmem:[%s3959_s15 + $0x80] sm:$0xff] %v2227_v45  ;;  %v2196_v3 = vmul.f32 %v2728_v47, %v2164_v56  ;;  %v2133_v5 = vmul.f32 %v2730_v49, %v2056_v9  ;;  %v2062_v24 = vpop.xlane.xlu1 %2061 }
 0x51c   : > { %2735 = vrcp.f32 %v2062_v24 }
 0x51d   : > { %v2228_v50 = vmul.f32 %v3898_v60, %v2196_v3  ;;  %v2165_v63 = vsub.f32 2.0, %v2133_v5 }
 0x51e   : > { %v2732_v10 = vpop.eup %2731 }
 0x51f   : > { %2260 = vst [vmem:[%s3959_s15 + $0x88] sm:$0xff] %v2228_v50  ;;  %v2197_v7 = vmul.f32 %v2730_v49, %v2165_v63  ;;  %v2134_v27 = vmul.f32 %v2732_v10, %v2058_v57  ;;  %v2064_v44 = vpop.xlane.xlu0 %2063 }
 0x520   : > { %2737 = vrcp.f32 %v2064_v44 }
 0x521   : > { %v2229_v55 = vmul.f32 %v3902_v2, %v2197_v7  ;;  %v2166_v30 = vsub.f32 2.0, %v2134_v27 }
 0x522   : > { %v2734_v15 = vpop.eup %2733 }
 0x523   : > { %2261 = vst [vmem:[%s3959_s15 + $0x90] sm:$0xff] %v2229_v55  ;;  %v2198_v19 = vmul.f32 %v2732_v10, %v2166_v30  ;;  %v2135_v16 = vmul.f32 %v2734_v15, %v2060_v62  ;;  %v2066_v25 = vpop.xlane.xlu1 %2065 }
 0x524   : > { %2739 = vrcp.f32 %v2066_v25 }
 0x525   : > { %v2230_v60 = vmul.f32 %v3906_v42, %v2198_v19  ;;  %v2167_v58 = vsub.f32 2.0, %v2135_v16 }
 0x526   : > { %v2736_v35 = vpop.eup %2735 }
 0x527   : > { %2262 = vst [vmem:[%s3959_s15 + $0x98] sm:$0xff] %v2230_v60  ;;  %v2199_v4 = vmul.f32 %v2734_v15, %v2167_v58  ;;  %v2136_v28 = vmul.f32 %v2736_v35, %v2062_v24  ;;  %v2068_v29 = vpop.xlane.xlu0 %2067 }
 0x528   : > { %2741 = vrcp.f32 %v2068_v29 }
 0x529   : > { %v2231_v2 = vmul.f32 %v3910_v14, %v2199_v4  ;;  %v2168_v11 = vsub.f32 2.0, %v2136_v28 }
 0x52a   : > { %v2738_v33 = vpop.eup %2737 }
 0x52b   : > { %2263 = vst [vmem:[%s3959_s15 + $0xa0] sm:$0xff] %v2231_v2  ;;  %v2200_v43 = vmul.f32 %v2736_v35, %v2168_v11  ;;  %v2137_v1 = vmul.f32 %v2738_v33, %v2064_v44  ;;  %v2070_v18 = vpop.xlane.xlu1 %2069 }
 0x52c   : > { %2743 = vrcp.f32 %v2070_v18 }
 0x52d   : > { %v2232_v42 = vmul.f32 %v3914_v0, %v2200_v43  ;;  %v2169_v17 = vsub.f32 2.0, %v2137_v1 }
 0x52e   : > { %v2740_v39 = vpop.eup %2739 }
 0x52f   : > { %2264 = vst [vmem:[%s3959_s15 + $0xa8] sm:$0xff] %v2232_v42  ;;  %v2201_v41 = vmul.f32 %v2738_v33, %v2169_v17  ;;  %v2138_v51 = vmul.f32 %v2740_v39, %v2066_v25  ;;  %v2072_v36 = vpop.xlane.xlu0 %2071 }
 0x530   : > { %2745 = vrcp.f32 %v2072_v36 }
 0x531   : > { %v2233_v14 = vmul.f32 %v3918_v21, %v2201_v41  ;;  %v2170_v6 = vsub.f32 2.0, %v2138_v51 }
 0x532   : > { %v2742_v46 = vpop.eup %2741 }
 0x533   : > { %2265 = vst [vmem:[%s3959_s15 + $0xb0] sm:$0xff] %v2233_v14  ;;  %v2202_v12 = vmul.f32 %v2740_v39, %v2170_v6  ;;  %v2139_v9 = vmul.f32 %v2742_v46, %v2068_v29  ;;  %v2074_v53 = vpop.xlane.xlu1 %2073 }
 0x534   : > { %2747 = vrcp.f32 %v2074_v53 }
 0x535   : > { %v2234_v0 = vmul.f32 %v3922_v26, %v2202_v12  ;;  %v2171_v22 = vsub.f32 2.0, %v2139_v9 }
 0x536   : > { %v2744_v52 = vpop.eup %2743 }
 0x537   : > { %2266 = vst [vmem:[%s3959_s15 + $0xb8] sm:$0xff] %v2234_v0  ;;  %v2203_v8 = vmul.f32 %v2742_v46, %v2171_v22  ;;  %v2140_v37 = vmul.f32 %v2744_v52, %v2070_v18  ;;  %v2076_v57 = vpop.xlane.xlu0 %2075 }
 0x538   : > { %2749 = vrcp.f32 %v2076_v57 }
 0x539   : > { %v2235_v21 = vmul.f32 %v3926_v32, %v2203_v8  ;;  %v2172_v38 = vsub.f32 2.0, %v2140_v37 }
 0x53a   : > { %v2746_v31 = vpop.eup %2745 }
 0x53b   : > { %2267 = vst [vmem:[%s3959_s15 + $0xc0] sm:$0xff] %v2235_v21  ;;  %v2204_v47 = vmul.f32 %v2744_v52, %v2172_v38  ;;  %v2141_v59 = vmul.f32 %v2746_v31, %v2072_v36  ;;  %v2078_v20 = vpop.xlane.xlu1 %2077 }
 0x53c   : > { %2751 = vrcp.f32 %v2078_v20 }
 0x53d   : > { %v2236_v26 = vmul.f32 %v3930_v40, %v2204_v47  ;;  %v2173_v62 = vsub.f32 2.0, %v2141_v59 }
 0x53e   : > { %v2748_v45 = vpop.eup %2747 }
 0x53f   : > { %2268 = vst [vmem:[%s3959_s15 + $0xc8] sm:$0xff] %v2236_v26  ;;  %v2205_v56 = vmul.f32 %v2746_v31, %v2173_v62  ;;  %v2142_v49 = vmul.f32 %v2748_v45, %v2074_v53  ;;  %v2080_v3 = vpop.xlane.xlu0 %2079 }
 0x540   : > { %2753 = vrcp.f32 %v2080_v3 }
 0x541   : > { %v2237_v32 = vmul.f32 %v3934_v48, %v2205_v56  ;;  %v2174_v5 = vsub.f32 2.0, %v2142_v49 }
 0x542   : > { %v2750_v24 = vpop.eup %2749 }
 0x543   : > { %2269 = vst [vmem:[%s3959_s15 + $0xd0] sm:$0xff] %v2237_v32  ;;  %v2206_v50 = vmul.f32 %v2748_v45, %v2174_v5  ;;  %v2143_v63 = vmul.f32 %v2750_v24, %v2076_v57  ;;  %v2082_v10 = vpop.xlane.xlu1 %2081 }
 0x544   : > { %2755 = vrcp.f32 %v2082_v10 }
 0x545   : > { %v2238_v40 = vmul.f32 %v3938_v54, %v2206_v50  ;;  %v2175_v7 = vsub.f32 2.0, %v2143_v63 }
 0x546   : > { %v2752_v27 = vpop.eup %2751 }
 0x547   : > { %2270 = vst [vmem:[%s3959_s15 + $0xd8] sm:$0xff] %v2238_v40  ;;  %v2207_v44 = vmul.f32 %v2750_v24, %v2175_v7  ;;  %v2144_v55 = vmul.f32 %v2752_v27, %v2078_v20 }
 0x549   : > { %v2239_v30 = vmul.f32 %v3942_v61, %v2207_v44  ;;  %v2176_v48 = vsub.f32 2.0, %v2144_v55 }
 0x54a   : > { %v2754_v15 = vpop.eup %2753 }
 0x54b   : > { %2271 = vst [vmem:[%s3959_s15 + $0xe0] sm:$0xff] %v2239_v30  ;;  %v2208_v19 = vmul.f32 %v2752_v27, %v2176_v48  ;;  %v2145_v16 = vmul.f32 %v2754_v15, %v2080_v3 }
 0x54d   : > { %v2240_v25 = vmul.f32 %v3945_v13, %v2208_v19  ;;  %v2177_v60 = vsub.f32 2.0, %v2145_v16 }
 0x54e   : > { %v2756_v58 = vpop.eup %2755 }
 0x54f   : > { %2272 = vst [vmem:[%s3959_s15 + $0xe8] sm:$0xff] %v2240_v25  ;;  %v2209_v54 = vmul.f32 %v2754_v15, %v2177_v60  ;;  %v2146_v35 = vmul.f32 %v2756_v58, %v2082_v10 }
 0x551   : > { %v2241_v4 = vmul.f32 %v3948_v23, %v2209_v54  ;;  %v2178_v28 = vsub.f32 2.0, %v2146_v35 }
 0x553   : > { %2273 = vst [vmem:[%s3959_s15 + $0xf0] sm:$0xff] %v2241_v4  ;;  %v2210_v29 = vmul.f32 %v2756_v58, %v2178_v28 }
 0x555   : > { %v2242_v61 = vmul.f32 %v3951_v34, %v2210_v29 }
 0x557   : > { %2274 = vst [vmem:[%s3959_s15 + $0xf8] sm:$0xff] %v2242_v61 }
 0x558 PF: > { %s17_s21 = sadd.s32 1, %s2795_s21  }
 0x559   : > { %p14_p3 = scmp.ge.s32.totalorder %s17_s21, 4  }
 0x55b   :  { %16 = sbr.rel (!%p14_p3) target bundleno = 1 (0x1), region = 81 }
 0x562   :  { %2297 = vsyncpa [#allocation3], 1 }
 0x563   :  { %2299 = vsyncpa [#allocation3 + $0x1], 1 }

</bundles_post_ra>
